<compile_context>
chip_gen: v7x
topology: tpu7x:2x2x1
jax: 0.10.0
libtpu: 0.0.40
codegen_flags: <defaults>
</compile_context>

<pallas_src>
import functools

import jax
import jax.numpy as jnp
from jax.experimental import pallas as pl
from jax.experimental.pallas import tpu as pltpu


def _lstm_kernel(seq_len, total_steps, x_ref, whh_ref, wih_ref, b_ref,
                 wfc_ref, bfc_ref, out_ref):
    """Entire LSTMCell + fc recurrence in a single kernel invocation."""
    B = x_ref.shape[0]
    Hp = whh_ref.shape[0]

    # Hoist all weight loads out of the time loop (loaded into vregs once).
    whh = whh_ref[...]          # (Hp, 4*Hp)  hidden->gates, pre-transposed, padded
    wih = wih_ref[...]          # (1, 4*Hp)   input(size 1)->gates
    b = b_ref[...]              # (1, 4*Hp)   bias_ih + bias_hh (padded cols = 0)
    wfc = wfc_ref[...]          # (1, Hp)     fc weight (padded cols = 0)
    bfc = bfc_ref[...]          # (1, 1)      fc bias

    h = jnp.zeros((B, Hp), jnp.float32)
    c = jnp.zeros((B, Hp), jnp.float32)
    out = jnp.zeros((B, 1), jnp.float32)

    # Static (fully unrolled) time loop: tiny trip count, gives the scheduler
    # cross-iteration visibility; all slice indices are compile-time constants.
    for t in range(total_steps):
        # Real sequence value while t < seq_len, fed-back prediction afterwards
        # (resolved at trace time, so no in-kernel select / clamped DMA).
        x_t = x_ref[:, t:t + 1] if t < seq_len else out            # (B, 1)

        # Single fused gate matmul; x contribution is a broadcast outer product
        # because input_size == 1.
        gates = (jnp.dot(h, whh, preferred_element_type=jnp.float32)
                 + x_t * wih + b)                                   # (B, 4*Hp)

        # PyTorch LSTMCell gate order: i, f, g, o.  Slices are vreg-aligned
        # because Hp is a multiple of 128.
        i_g = jax.nn.sigmoid(gates[:, 0 * Hp:1 * Hp])
        f_g = jax.nn.sigmoid(gates[:, 1 * Hp:2 * Hp])
        g_g = jnp.tanh(gates[:, 2 * Hp:3 * Hp])
        o_g = jax.nn.sigmoid(gates[:, 3 * Hp:4 * Hp])

        c = f_g * c + i_g * g_g
        h = o_g * jnp.tanh(c)

        # fc head: Linear(hidden, 1) as VPU mul + cross-lane (XLU) reduce.
        out = jnp.sum(h * wfc, axis=-1, keepdims=True) + bfc        # (B, 1)

        out_ref[:, t:t + 1] = out


def lstm_predictor_forward(x, weight_ih, weight_hh, bias_ih, bias_hh, fc_w,
                           fc_b, future=0):
    """x: (B, T) float32; raw PyTorch-layout weights.  Returns (B, T + future)."""
    B, T = x.shape
    H = weight_hh.shape[1]
    assert weight_ih.shape == (4 * H, 1)     # forward() splits x into (B, 1) steps
    T_total = T + future
    Hp = ((H + 127) // 128) * 128            # pad hidden dim to lane width (128)

    f32 = jnp.float32
    # --- repack weights for the fused-gate layout: columns = [i|f|g|o] * Hp ---
    # whh_packed[k, g*Hp + u] = weight_hh[g*H + u, k]   (zeros in padded rows/cols)
    whh = jnp.zeros((Hp, 4, Hp), f32).at[:H, :, :H].set(
        jnp.transpose(weight_hh.reshape(4, H, H), (2, 0, 1))).reshape(Hp, 4 * Hp)
    wih = jnp.zeros((1, 4, Hp), f32).at[0, :, :H].set(
        weight_ih.reshape(4, H)).reshape(1, 4 * Hp)
    b = jnp.zeros((1, 4, Hp), f32).at[0, :, :H].set(
        (bias_ih + bias_hh).reshape(4, H)).reshape(1, 4 * Hp)
    wfc = jnp.zeros((1, Hp), f32).at[:, :H].set(fc_w)
    bfc = fc_b.reshape(1, 1).astype(f32)

    kernel = functools.partial(_lstm_kernel, T, T_total)
    vmem = pltpu.MemorySpace.VMEM
    return pl.pallas_call(
        kernel,
        out_shape=jax.ShapeDtypeStruct((B, T_total), f32),
        # No grid: single invocation; every operand is one full-array VMEM block,
        # DMAed exactly once and resident for the whole recurrence.
        in_specs=[pl.BlockSpec(memory_space=vmem)] * 6,
        out_specs=pl.BlockSpec(memory_space=vmem),
    )(x.astype(f32), whh, wih, b, wfc, bfc)


def ref_forward(x, weight_ih, weight_hh, bias_ih, bias_hh, fc_w, fc_b, future=0):
    """Pure-JAX reference with raw PyTorch-layout weights."""
    B, T = x.shape
    H = weight_hh.shape[1]
    h = jnp.zeros((B, H), jnp.float32)
    c = jnp.zeros((B, H), jnp.float32)
    out = jnp.zeros((B, 1), jnp.float32)
    outs = []
    for t in range(T + future):
        xt = x[:, t:t + 1] if t < T else out
        gates = xt @ weight_ih.T + bias_ih + h @ weight_hh.T + bias_hh
        i, f, g, o = jnp.split(gates, 4, axis=1)
        i = jax.nn.sigmoid(i)
        f = jax.nn.sigmoid(f)
        g = jnp.tanh(g)
        o = jax.nn.sigmoid(o)
        c = f * c + i * g
        h = o * jnp.tanh(c)
        out = h @ fc_w.T + fc_b
        outs.append(out)
    return jnp.concatenate(outs, axis=1)


if __name__ == "__main__":
    B, T, H = 2, 8, 51          # hidden_size=51 is the module's default
    INPUT_SIZE = 1              # implied by x.split(1, dim=1) in forward
    FUTURE = 4

    key = jax.random.PRNGKey(0)
    k_wih, k_whh, k_bih, k_bhh, k_fw, k_fb, k_x = jax.random.split(key, 7)
    bound = 1.0 / (H ** 0.5)    # PyTorch uniform(-1/sqrt(H), 1/sqrt(H)) init

    weight_ih = jax.random.uniform(k_wih, (4 * H, INPUT_SIZE), jnp.float32, -bound, bound)
    weight_hh = jax.random.uniform(k_whh, (4 * H, H), jnp.float32, -bound, bound)
    bias_ih = jax.random.uniform(k_bih, (4 * H,), jnp.float32, -bound, bound)
    bias_hh = jax.random.uniform(k_bhh, (4 * H,), jnp.float32, -bound, bound)
    fc_w = jax.random.uniform(k_fw, (1, H), jnp.float32, -bound, bound)
    fc_b = jax.random.uniform(k_fb, (1,), jnp.float32, -bound, bound)

    x = jax.random.normal(k_x, (B, T), jnp.float32)

    out = lstm_predictor_forward(x, weight_ih, weight_hh, bias_ih, bias_hh,
                                 fc_w, fc_b, future=FUTURE)
    out = jax.block_until_ready(out)

    expected = ref_forward(x, weight_ih, weight_hh, bias_ih, bias_hh,
                           fc_w, fc_b, future=FUTURE)
    assert out.shape == (B, T + FUTURE), out.shape
    assert jnp.allclose(out, expected, rtol=1e-5, atol=1e-5), (
        float(jnp.max(jnp.abs(out - expected))))

    print("KERNEL_OK")
</pallas_src>

<mosaic_0001>
module attributes {stable_mosaic.version = 11 : i64} {
  func.func @_lstm_kernel(%arg0: memref<2x8xf32, #tpu.memory_space<vmem>>, %arg1: memref<128x512xf32, #tpu.memory_space<vmem>>, %arg2: memref<1x512xf32, #tpu.memory_space<vmem>>, %arg3: memref<1x512xf32, #tpu.memory_space<vmem>>, %arg4: memref<1x128xf32, #tpu.memory_space<vmem>>, %arg5: memref<1x1xf32, #tpu.memory_space<vmem>>, %arg6: memref<2x12xf32, #tpu.memory_space<vmem>>) attributes {dimension_semantics = [], scalar_prefetch = 0 : i64, scratch_operands = 0 : i64, tpu.core_type = #tpu.core_type<tc>} {
    %c0 = arith.constant 0 : index
    %c0_0 = arith.constant 0 : index
    %0 = vector.load %arg1[%c0, %c0_0] : memref<128x512xf32, #tpu.memory_space<vmem>>, vector<128x512xf32>
    %c0_1 = arith.constant 0 : index
    %c0_2 = arith.constant 0 : index
    %1 = vector.load %arg2[%c0_1, %c0_2] : memref<1x512xf32, #tpu.memory_space<vmem>>, vector<1x512xf32>
    %c0_3 = arith.constant 0 : index
    %c0_4 = arith.constant 0 : index
    %2 = vector.load %arg3[%c0_3, %c0_4] : memref<1x512xf32, #tpu.memory_space<vmem>>, vector<1x512xf32>
    %c0_5 = arith.constant 0 : index
    %c0_6 = arith.constant 0 : index
    %3 = vector.load %arg4[%c0_5, %c0_6] : memref<1x128xf32, #tpu.memory_space<vmem>>, vector<1x128xf32>
    %c0_7 = arith.constant 0 : index
    %c0_8 = arith.constant 0 : index
    %4 = vector.load %arg5[%c0_7, %c0_8] : memref<1x1xf32, #tpu.memory_space<vmem>>, vector<1x1xf32>
    %cst = arith.constant 0.000000e+00 : f32
    %5 = vector.broadcast %cst : f32 to vector<2x128xf32>
    %cst_9 = arith.constant 0.000000e+00 : f32
    %6 = vector.broadcast %cst_9 : f32 to vector<2x128xf32>
    %c0_10 = arith.constant 0 : index
    %c0_11 = arith.constant 0 : index
    %7 = vector.load %arg0[%c0_10, %c0_11] : memref<2x8xf32, #tpu.memory_space<vmem>>, vector<2x1xf32>
    %cst_12 = arith.constant dense<0.000000e+00> : vector<2x512xf32>
    %8 = tpu.matmul %5, %0, %cst_12 {dimension_numbers = #tpu.dot_dimension_numbers<[1], [0], [0], [1], [0, 0, 1, 1], [], []>} : vector<2x128xf32>, vector<128x512xf32>, vector<2x512xf32> -> vector<2x512xf32>
    %9 = vector.broadcast %7 : vector<2x1xf32> to vector<2x512xf32>
    %10 = vector.broadcast %1 : vector<1x512xf32> to vector<2x512xf32>
    %11 = arith.mulf %9, %10 : vector<2x512xf32>
    %12 = arith.addf %8, %11 : vector<2x512xf32>
    %13 = vector.broadcast %2 : vector<1x512xf32> to vector<2x512xf32>
    %14 = arith.addf %12, %13 : vector<2x512xf32>
    %15 = vector.extract_strided_slice %14 {offsets = [0, 0], sizes = [2, 128], strides = [1, 1]} : vector<2x512xf32> to vector<2x128xf32>
    %16 = arith.negf %15 : vector<2x128xf32>
    %17 = math.exp %16 : vector<2x128xf32>
    %cst_13 = arith.constant 1.000000e+00 : f32
    %18 = vector.broadcast %cst_13 : f32 to vector<2x128xf32>
    %19 = arith.addf %18, %17 : vector<2x128xf32>
    %20 = arith.divf %18, %19 : vector<2x128xf32>
    %21 = vector.extract_strided_slice %14 {offsets = [0, 128], sizes = [2, 128], strides = [1, 1]} : vector<2x512xf32> to vector<2x128xf32>
    %22 = arith.negf %21 : vector<2x128xf32>
    %23 = math.exp %22 : vector<2x128xf32>
    %cst_14 = arith.constant 1.000000e+00 : f32
    %24 = vector.broadcast %cst_14 : f32 to vector<2x128xf32>
    %25 = arith.addf %24, %23 : vector<2x128xf32>
    %26 = arith.divf %24, %25 : vector<2x128xf32>
    %27 = vector.extract_strided_slice %14 {offsets = [0, 256], sizes = [2, 128], strides = [1, 1]} : vector<2x512xf32> to vector<2x128xf32>
    %28 = math.tanh %27 : vector<2x128xf32>
    %29 = vector.extract_strided_slice %14 {offsets = [0, 384], sizes = [2, 128], strides = [1, 1]} : vector<2x512xf32> to vector<2x128xf32>
    %30 = arith.negf %29 : vector<2x128xf32>
    %31 = math.exp %30 : vector<2x128xf32>
    %cst_15 = arith.constant 1.000000e+00 : f32
    %32 = vector.broadcast %cst_15 : f32 to vector<2x128xf32>
    %33 = arith.addf %32, %31 : vector<2x128xf32>
    %34 = arith.divf %32, %33 : vector<2x128xf32>
    %35 = arith.mulf %26, %6 : vector<2x128xf32>
    %36 = arith.mulf %20, %28 : vector<2x128xf32>
    %37 = arith.addf %35, %36 : vector<2x128xf32>
    %38 = math.tanh %37 : vector<2x128xf32>
    %39 = arith.mulf %34, %38 : vector<2x128xf32>
    %40 = vector.broadcast %3 : vector<1x128xf32> to vector<2x128xf32>
    %41 = arith.mulf %39, %40 : vector<2x128xf32>
    %cst_16 = arith.constant dense<0.000000e+00> : vector<2xf32>
    %42 = vector.multi_reduction <add>, %41, %cst_16 [1] : vector<2x128xf32> to vector<2xf32>
    %43 = vector.shape_cast %42 : vector<2xf32> to vector<2x1xf32>
    %44 = vector.broadcast %4 : vector<1x1xf32> to vector<2x1xf32>
    %45 = arith.addf %43, %44 : vector<2x1xf32>
    %c0_17 = arith.constant 0 : index
    %c0_18 = arith.constant 0 : index
    %46 = vector.load %arg6[%c0_17, %c0_18] : memref<2x12xf32, #tpu.memory_space<vmem>>, vector<2x1xf32>
    tpu.vector_store %arg6[%c0_17, %c0_18], %45 {strides = array<i32>} : memref<2x12xf32, #tpu.memory_space<vmem>>, vector<2x1xf32>,
    %c0_19 = arith.constant 0 : index
    %c1 = arith.constant 1 : index
    %47 = vector.load %arg0[%c0_19, %c1] : memref<2x8xf32, #tpu.memory_space<vmem>>, vector<2x1xf32>
    %cst_20 = arith.constant dense<0.000000e+00> : vector<2x512xf32>
    %48 = tpu.matmul %39, %0, %cst_20 {dimension_numbers = #tpu.dot_dimension_numbers<[1], [0], [0], [1], [0, 0, 1, 1], [], []>} : vector<2x128xf32>, vector<128x512xf32>, vector<2x512xf32> -> vector<2x512xf32>
    %49 = vector.broadcast %47 : vector<2x1xf32> to vector<2x512xf32>
    %50 = vector.broadcast %1 : vector<1x512xf32> to vector<2x512xf32>
    %51 = arith.mulf %49, %50 : vector<2x512xf32>
    %52 = arith.addf %48, %51 : vector<2x512xf32>
    %53 = vector.broadcast %2 : vector<1x512xf32> to vector<2x512xf32>
    %54 = arith.addf %52, %53 : vector<2x512xf32>
    %55 = vector.extract_strided_slice %54 {offsets = [0, 0], sizes = [2, 128], strides = [1, 1]} : vector<2x512xf32> to vector<2x128xf32>
    %56 = arith.negf %55 : vector<2x128xf32>
    %57 = math.exp %56 : vector<2x128xf32>
    %cst_21 = arith.constant 1.000000e+00 : f32
    %58 = vector.broadcast %cst_21 : f32 to vector<2x128xf32>
    %59 = arith.addf %58, %57 : vector<2x128xf32>
    %60 = arith.divf %58, %59 : vector<2x128xf32>
    %61 = vector.extract_strided_slice %54 {offsets = [0, 128], sizes = [2, 128], strides = [1, 1]} : vector<2x512xf32> to vector<2x128xf32>
    %62 = arith.negf %61 : vector<2x128xf32>
    %63 = math.exp %62 : vector<2x128xf32>
    %cst_22 = arith.constant 1.000000e+00 : f32
    %64 = vector.broadcast %cst_22 : f32 to vector<2x128xf32>
    %65 = arith.addf %64, %63 : vector<2x128xf32>
    %66 = arith.divf %64, %65 : vector<2x128xf32>
    %67 = vector.extract_strided_slice %54 {offsets = [0, 256], sizes = [2, 128], strides = [1, 1]} : vector<2x512xf32> to vector<2x128xf32>
    %68 = math.tanh %67 : vector<2x128xf32>
    %69 = vector.extract_strided_slice %54 {offsets = [0, 384], sizes = [2, 128], strides = [1, 1]} : vector<2x512xf32> to vector<2x128xf32>
    %70 = arith.negf %69 : vector<2x128xf32>
    %71 = math.exp %70 : vector<2x128xf32>
    %cst_23 = arith.constant 1.000000e+00 : f32
    %72 = vector.broadcast %cst_23 : f32 to vector<2x128xf32>
    %73 = arith.addf %72, %71 : vector<2x128xf32>
    %74 = arith.divf %72, %73 : vector<2x128xf32>
    %75 = arith.mulf %66, %37 : vector<2x128xf32>
    %76 = arith.mulf %60, %68 : vector<2x128xf32>
    %77 = arith.addf %75, %76 : vector<2x128xf32>
    %78 = math.tanh %77 : vector<2x128xf32>
    %79 = arith.mulf %74, %78 : vector<2x128xf32>
    %80 = vector.broadcast %3 : vector<1x128xf32> to vector<2x128xf32>
    %81 = arith.mulf %79, %80 : vector<2x128xf32>
    %cst_24 = arith.constant dense<0.000000e+00> : vector<2xf32>
    %82 = vector.multi_reduction <add>, %81, %cst_24 [1] : vector<2x128xf32> to vector<2xf32>
    %83 = vector.shape_cast %82 : vector<2xf32> to vector<2x1xf32>
    %84 = vector.broadcast %4 : vector<1x1xf32> to vector<2x1xf32>
    %85 = arith.addf %83, %84 : vector<2x1xf32>
    %c0_25 = arith.constant 0 : index
    %c1_26 = arith.constant 1 : index
    %86 = vector.load %arg6[%c0_25, %c1_26] : memref<2x12xf32, #tpu.memory_space<vmem>>, vector<2x1xf32>
    tpu.vector_store %arg6[%c0_25, %c1_26], %85 {strides = array<i32>} : memref<2x12xf32, #tpu.memory_space<vmem>>, vector<2x1xf32>,
    %c0_27 = arith.constant 0 : index
    %c2 = arith.constant 2 : index
    %87 = vector.load %arg0[%c0_27, %c2] : memref<2x8xf32, #tpu.memory_space<vmem>>, vector<2x1xf32>
    %cst_28 = arith.constant dense<0.000000e+00> : vector<2x512xf32>
    %88 = tpu.matmul %79, %0, %cst_28 {dimension_numbers = #tpu.dot_dimension_numbers<[1], [0], [0], [1], [0, 0, 1, 1], [], []>} : vector<2x128xf32>, vector<128x512xf32>, vector<2x512xf32> -> vector<2x512xf32>
    %89 = vector.broadcast %87 : vector<2x1xf32> to vector<2x512xf32>
    %90 = vector.broadcast %1 : vector<1x512xf32> to vector<2x512xf32>
    %91 = arith.mulf %89, %90 : vector<2x512xf32>
    %92 = arith.addf %88, %91 : vector<2x512xf32>
    %93 = vector.broadcast %2 : vector<1x512xf32> to vector<2x512xf32>
    %94 = arith.addf %92, %93 : vector<2x512xf32>
    %95 = vector.extract_strided_slice %94 {offsets = [0, 0], sizes = [2, 128], strides = [1, 1]} : vector<2x512xf32> to vector<2x128xf32>
    %96 = arith.negf %95 : vector<2x128xf32>
    %97 = math.exp %96 : vector<2x128xf32>
    %cst_29 = arith.constant 1.000000e+00 : f32
    %98 = vector.broadcast %cst_29 : f32 to vector<2x128xf32>
    %99 = arith.addf %98, %97 : vector<2x128xf32>
    %100 = arith.divf %98, %99 : vector<2x128xf32>
    %101 = vector.extract_strided_slice %94 {offsets = [0, 128], sizes = [2, 128], strides = [1, 1]} : vector<2x512xf32> to vector<2x128xf32>
    %102 = arith.negf %101 : vector<2x128xf32>
    %103 = math.exp %102 : vector<2x128xf32>
    %cst_30 = arith.constant 1.000000e+00 : f32
    %104 = vector.broadcast %cst_30 : f32 to vector<2x128xf32>
    %105 = arith.addf %104, %103 : vector<2x128xf32>
    %106 = arith.divf %104, %105 : vector<2x128xf32>
    %107 = vector.extract_strided_slice %94 {offsets = [0, 256], sizes = [2, 128], strides = [1, 1]} : vector<2x512xf32> to vector<2x128xf32>
    %108 = math.tanh %107 : vector<2x128xf32>
    %109 = vector.extract_strided_slice %94 {offsets = [0, 384], sizes = [2, 128], strides = [1, 1]} : vector<2x512xf32> to vector<2x128xf32>
    %110 = arith.negf %109 : vector<2x128xf32>
    %111 = math.exp %110 : vector<2x128xf32>
    %cst_31 = arith.constant 1.000000e+00 : f32
    %112 = vector.broadcast %cst_31 : f32 to vector<2x128xf32>
    %113 = arith.addf %112, %111 : vector<2x128xf32>
    %114 = arith.divf %112, %113 : vector<2x128xf32>
    %115 = arith.mulf %106, %77 : vector<2x128xf32>
    %116 = arith.mulf %100, %108 : vector<2x128xf32>
    %117 = arith.addf %115, %116 : vector<2x128xf32>
    %118 = math.tanh %117 : vector<2x128xf32>
    %119 = arith.mulf %114, %118 : vector<2x128xf32>
    %120 = vector.broadcast %3 : vector<1x128xf32> to vector<2x128xf32>
    %121 = arith.mulf %119, %120 : vector<2x128xf32>
    %cst_32 = arith.constant dense<0.000000e+00> : vector<2xf32>
    %122 = vector.multi_reduction <add>, %121, %cst_32 [1] : vector<2x128xf32> to vector<2xf32>
    %123 = vector.shape_cast %122 : vector<2xf32> to vector<2x1xf32>
    %124 = vector.broadcast %4 : vector<1x1xf32> to vector<2x1xf32>
    %125 = arith.addf %123, %124 : vector<2x1xf32>
    %c0_33 = arith.constant 0 : index
    %c2_34 = arith.constant 2 : index
    %126 = vector.load %arg6[%c0_33, %c2_34] : memref<2x12xf32, #tpu.memory_space<vmem>>, vector<2x1xf32>
    tpu.vector_store %arg6[%c0_33, %c2_34], %125 {strides = array<i32>} : memref<2x12xf32, #tpu.memory_space<vmem>>, vector<2x1xf32>,
    %c0_35 = arith.constant 0 : index
    %c3 = arith.constant 3 : index
    %127 = vector.load %arg0[%c0_35, %c3] : memref<2x8xf32, #tpu.memory_space<vmem>>, vector<2x1xf32>
    %cst_36 = arith.constant dense<0.000000e+00> : vector<2x512xf32>
    %128 = tpu.matmul %119, %0, %cst_36 {dimension_numbers = #tpu.dot_dimension_numbers<[1], [0], [0], [1], [0, 0, 1, 1], [], []>} : vector<2x128xf32>, vector<128x512xf32>, vector<2x512xf32> -> vector<2x512xf32>
    %129 = vector.broadcast %127 : vector<2x1xf32> to vector<2x512xf32>
    %130 = vector.broadcast %1 : vector<1x512xf32> to vector<2x512xf32>
    %131 = arith.mulf %129, %130 : vector<2x512xf32>
    %132 = arith.addf %128, %131 : vector<2x512xf32>
    %133 = vector.broadcast %2 : vector<1x512xf32> to vector<2x512xf32>
    %134 = arith.addf %132, %133 : vector<2x512xf32>
    %135 = vector.extract_strided_slice %134 {offsets = [0, 0], sizes = [2, 128], strides = [1, 1]} : vector<2x512xf32> to vector<2x128xf32>
    %136 = arith.negf %135 : vector<2x128xf32>
    %137 = math.exp %136 : vector<2x128xf32>
    %cst_37 = arith.constant 1.000000e+00 : f32
    %138 = vector.broadcast %cst_37 : f32 to vector<2x128xf32>
    %139 = arith.addf %138, %137 : vector<2x128xf32>
    %140 = arith.divf %138, %139 : vector<2x128xf32>
    %141 = vector.extract_strided_slice %134 {offsets = [0, 128], sizes = [2, 128], strides = [1, 1]} : vector<2x512xf32> to vector<2x128xf32>
    %142 = arith.negf %141 : vector<2x128xf32>
    %143 = math.exp %142 : vector<2x128xf32>
    %cst_38 = arith.constant 1.000000e+00 : f32
    %144 = vector.broadcast %cst_38 : f32 to vector<2x128xf32>
    %145 = arith.addf %144, %143 : vector<2x128xf32>
    %146 = arith.divf %144, %145 : vector<2x128xf32>
    %147 = vector.extract_strided_slice %134 {offsets = [0, 256], sizes = [2, 128], strides = [1, 1]} : vector<2x512xf32> to vector<2x128xf32>
    %148 = math.tanh %147 : vector<2x128xf32>
    %149 = vector.extract_strided_slice %134 {offsets = [0, 384], sizes = [2, 128], strides = [1, 1]} : vector<2x512xf32> to vector<2x128xf32>
    %150 = arith.negf %149 : vector<2x128xf32>
    %151 = math.exp %150 : vector<2x128xf32>
    %cst_39 = arith.constant 1.000000e+00 : f32
    %152 = vector.broadcast %cst_39 : f32 to vector<2x128xf32>
    %153 = arith.addf %152, %151 : vector<2x128xf32>
    %154 = arith.divf %152, %153 : vector<2x128xf32>
    %155 = arith.mulf %146, %117 : vector<2x128xf32>
    %156 = arith.mulf %140, %148 : vector<2x128xf32>
    %157 = arith.addf %155, %156 : vector<2x128xf32>
    %158 = math.tanh %157 : vector<2x128xf32>
    %159 = arith.mulf %154, %158 : vector<2x128xf32>
    %160 = vector.broadcast %3 : vector<1x128xf32> to vector<2x128xf32>
    %161 = arith.mulf %159, %160 : vector<2x128xf32>
    %cst_40 = arith.constant dense<0.000000e+00> : vector<2xf32>
    %162 = vector.multi_reduction <add>, %161, %cst_40 [1] : vector<2x128xf32> to vector<2xf32>
    %163 = vector.shape_cast %162 : vector<2xf32> to vector<2x1xf32>
    %164 = vector.broadcast %4 : vector<1x1xf32> to vector<2x1xf32>
    %165 = arith.addf %163, %164 : vector<2x1xf32>
    %c0_41 = arith.constant 0 : index
    %c3_42 = arith.constant 3 : index
    %166 = vector.load %arg6[%c0_41, %c3_42] : memref<2x12xf32, #tpu.memory_space<vmem>>, vector<2x1xf32>
    tpu.vector_store %arg6[%c0_41, %c3_42], %165 {strides = array<i32>} : memref<2x12xf32, #tpu.memory_space<vmem>>, vector<2x1xf32>,
    %c0_43 = arith.constant 0 : index
    %c4 = arith.constant 4 : index
    %167 = vector.load %arg0[%c0_43, %c4] : memref<2x8xf32, #tpu.memory_space<vmem>>, vector<2x1xf32>
    %cst_44 = arith.constant dense<0.000000e+00> : vector<2x512xf32>
    %168 = tpu.matmul %159, %0, %cst_44 {dimension_numbers = #tpu.dot_dimension_numbers<[1], [0], [0], [1], [0, 0, 1, 1], [], []>} : vector<2x128xf32>, vector<128x512xf32>, vector<2x512xf32> -> vector<2x512xf32>
    %169 = vector.broadcast %167 : vector<2x1xf32> to vector<2x512xf32>
    %170 = vector.broadcast %1 : vector<1x512xf32> to vector<2x512xf32>
    %171 = arith.mulf %169, %170 : vector<2x512xf32>
    %172 = arith.addf %168, %171 : vector<2x512xf32>
    %173 = vector.broadcast %2 : vector<1x512xf32> to vector<2x512xf32>
    %174 = arith.addf %172, %173 : vector<2x512xf32>
    %175 = vector.extract_strided_slice %174 {offsets = [0, 0], sizes = [2, 128], strides = [1, 1]} : vector<2x512xf32> to vector<2x128xf32>
    %176 = arith.negf %175 : vector<2x128xf32>
    %177 = math.exp %176 : vector<2x128xf32>
    %cst_45 = arith.constant 1.000000e+00 : f32
    %178 = vector.broadcast %cst_45 : f32 to vector<2x128xf32>
    %179 = arith.addf %178, %177 : vector<2x128xf32>
    %180 = arith.divf %178, %179 : vector<2x128xf32>
    %181 = vector.extract_strided_slice %174 {offsets = [0, 128], sizes = [2, 128], strides = [1, 1]} : vector<2x512xf32> to vector<2x128xf32>
    %182 = arith.negf %181 : vector<2x128xf32>
    %183 = math.exp %182 : vector<2x128xf32>
    %cst_46 = arith.constant 1.000000e+00 : f32
    %184 = vector.broadcast %cst_46 : f32 to vector<2x128xf32>
    %185 = arith.addf %184, %183 : vector<2x128xf32>
    %186 = arith.divf %184, %185 : vector<2x128xf32>
    %187 = vector.extract_strided_slice %174 {offsets = [0, 256], sizes = [2, 128], strides = [1, 1]} : vector<2x512xf32> to vector<2x128xf32>
    %188 = math.tanh %187 : vector<2x128xf32>
    %189 = vector.extract_strided_slice %174 {offsets = [0, 384], sizes = [2, 128], strides = [1, 1]} : vector<2x512xf32> to vector<2x128xf32>
    %190 = arith.negf %189 : vector<2x128xf32>
    %191 = math.exp %190 : vector<2x128xf32>
    %cst_47 = arith.constant 1.000000e+00 : f32
    %192 = vector.broadcast %cst_47 : f32 to vector<2x128xf32>
    %193 = arith.addf %192, %191 : vector<2x128xf32>
    %194 = arith.divf %192, %193 : vector<2x128xf32>
    %195 = arith.mulf %186, %157 : vector<2x128xf32>
    %196 = arith.mulf %180, %188 : vector<2x128xf32>
    %197 = arith.addf %195, %196 : vector<2x128xf32>
    %198 = math.tanh %197 : vector<2x128xf32>
    %199 = arith.mulf %194, %198 : vector<2x128xf32>
    %200 = vector.broadcast %3 : vector<1x128xf32> to vector<2x128xf32>
    %201 = arith.mulf %199, %200 : vector<2x128xf32>
    %cst_48 = arith.constant dense<0.000000e+00> : vector<2xf32>
    %202 = vector.multi_reduction <add>, %201, %cst_48 [1] : vector<2x128xf32> to vector<2xf32>
    %203 = vector.shape_cast %202 : vector<2xf32> to vector<2x1xf32>
    %204 = vector.broadcast %4 : vector<1x1xf32> to vector<2x1xf32>
    %205 = arith.addf %203, %204 : vector<2x1xf32>
    %c0_49 = arith.constant 0 : index
    %c4_50 = arith.constant 4 : index
    %206 = vector.load %arg6[%c0_49, %c4_50] : memref<2x12xf32, #tpu.memory_space<vmem>>, vector<2x1xf32>
    tpu.vector_store %arg6[%c0_49, %c4_50], %205 {strides = array<i32>} : memref<2x12xf32, #tpu.memory_space<vmem>>, vector<2x1xf32>,
    %c0_51 = arith.constant 0 : index
    %c5 = arith.constant 5 : index
    %207 = vector.load %arg0[%c0_51, %c5] : memref<2x8xf32, #tpu.memory_space<vmem>>, vector<2x1xf32>
    %cst_52 = arith.constant dense<0.000000e+00> : vector<2x512xf32>
    %208 = tpu.matmul %199, %0, %cst_52 {dimension_numbers = #tpu.dot_dimension_numbers<[1], [0], [0], [1], [0, 0, 1, 1], [], []>} : vector<2x128xf32>, vector<128x512xf32>, vector<2x512xf32> -> vector<2x512xf32>
    %209 = vector.broadcast %207 : vector<2x1xf32> to vector<2x512xf32>
    %210 = vector.broadcast %1 : vector<1x512xf32> to vector<2x512xf32>
    %211 = arith.mulf %209, %210 : vector<2x512xf32>
    %212 = arith.addf %208, %211 : vector<2x512xf32>
    %213 = vector.broadcast %2 : vector<1x512xf32> to vector<2x512xf32>
    %214 = arith.addf %212, %213 : vector<2x512xf32>
    %215 = vector.extract_strided_slice %214 {offsets = [0, 0], sizes = [2, 128], strides = [1, 1]} : vector<2x512xf32> to vector<2x128xf32>
    %216 = arith.negf %215 : vector<2x128xf32>
    %217 = math.exp %216 : vector<2x128xf32>
    %cst_53 = arith.constant 1.000000e+00 : f32
    %218 = vector.broadcast %cst_53 : f32 to vector<2x128xf32>
    %219 = arith.addf %218, %217 : vector<2x128xf32>
    %220 = arith.divf %218, %219 : vector<2x128xf32>
    %221 = vector.extract_strided_slice %214 {offsets = [0, 128], sizes = [2, 128], strides = [1, 1]} : vector<2x512xf32> to vector<2x128xf32>
    %222 = arith.negf %221 : vector<2x128xf32>
    %223 = math.exp %222 : vector<2x128xf32>
    %cst_54 = arith.constant 1.000000e+00 : f32
    %224 = vector.broadcast %cst_54 : f32 to vector<2x128xf32>
    %225 = arith.addf %224, %223 : vector<2x128xf32>
    %226 = arith.divf %224, %225 : vector<2x128xf32>
    %227 = vector.extract_strided_slice %214 {offsets = [0, 256], sizes = [2, 128], strides = [1, 1]} : vector<2x512xf32> to vector<2x128xf32>
    %228 = math.tanh %227 : vector<2x128xf32>
    %229 = vector.extract_strided_slice %214 {offsets = [0, 384], sizes = [2, 128], strides = [1, 1]} : vector<2x512xf32> to vector<2x128xf32>
    %230 = arith.negf %229 : vector<2x128xf32>
    %231 = math.exp %230 : vector<2x128xf32>
    %cst_55 = arith.constant 1.000000e+00 : f32
    %232 = vector.broadcast %cst_55 : f32 to vector<2x128xf32>
    %233 = arith.addf %232, %231 : vector<2x128xf32>
    %234 = arith.divf %232, %233 : vector<2x128xf32>
    %235 = arith.mulf %226, %197 : vector<2x128xf32>
    %236 = arith.mulf %220, %228 : vector<2x128xf32>
    %237 = arith.addf %235, %236 : vector<2x128xf32>
    %238 = math.tanh %237 : vector<2x128xf32>
    %239 = arith.mulf %234, %238 : vector<2x128xf32>
    %240 = vector.broadcast %3 : vector<1x128xf32> to vector<2x128xf32>
    %241 = arith.mulf %239, %240 : vector<2x128xf32>
    %cst_56 = arith.constant dense<0.000000e+00> : vector<2xf32>
    %242 = vector.multi_reduction <add>, %241, %cst_56 [1] : vector<2x128xf32> to vector<2xf32>
    %243 = vector.shape_cast %242 : vector<2xf32> to vector<2x1xf32>
    %244 = vector.broadcast %4 : vector<1x1xf32> to vector<2x1xf32>
    %245 = arith.addf %243, %244 : vector<2x1xf32>
    %c0_57 = arith.constant 0 : index
    %c5_58 = arith.constant 5 : index
    %246 = vector.load %arg6[%c0_57, %c5_58] : memref<2x12xf32, #tpu.memory_space<vmem>>, vector<2x1xf32>
    tpu.vector_store %arg6[%c0_57, %c5_58], %245 {strides = array<i32>} : memref<2x12xf32, #tpu.memory_space<vmem>>, vector<2x1xf32>,
    %c0_59 = arith.constant 0 : index
    %c6 = arith.constant 6 : index
    %247 = vector.load %arg0[%c0_59, %c6] : memref<2x8xf32, #tpu.memory_space<vmem>>, vector<2x1xf32>
    %cst_60 = arith.constant dense<0.000000e+00> : vector<2x512xf32>
    %248 = tpu.matmul %239, %0, %cst_60 {dimension_numbers = #tpu.dot_dimension_numbers<[1], [0], [0], [1], [0, 0, 1, 1], [], []>} : vector<2x128xf32>, vector<128x512xf32>, vector<2x512xf32> -> vector<2x512xf32>
    %249 = vector.broadcast %247 : vector<2x1xf32> to vector<2x512xf32>
    %250 = vector.broadcast %1 : vector<1x512xf32> to vector<2x512xf32>
    %251 = arith.mulf %249, %250 : vector<2x512xf32>
    %252 = arith.addf %248, %251 : vector<2x512xf32>
    %253 = vector.broadcast %2 : vector<1x512xf32> to vector<2x512xf32>
    %254 = arith.addf %252, %253 : vector<2x512xf32>
    %255 = vector.extract_strided_slice %254 {offsets = [0, 0], sizes = [2, 128], strides = [1, 1]} : vector<2x512xf32> to vector<2x128xf32>
    %256 = arith.negf %255 : vector<2x128xf32>
    %257 = math.exp %256 : vector<2x128xf32>
    %cst_61 = arith.constant 1.000000e+00 : f32
    %258 = vector.broadcast %cst_61 : f32 to vector<2x128xf32>
    %259 = arith.addf %258, %257 : vector<2x128xf32>
    %260 = arith.divf %258, %259 : vector<2x128xf32>
    %261 = vector.extract_strided_slice %254 {offsets = [0, 128], sizes = [2, 128], strides = [1, 1]} : vector<2x512xf32> to vector<2x128xf32>
    %262 = arith.negf %261 : vector<2x128xf32>
    %263 = math.exp %262 : vector<2x128xf32>
    %cst_62 = arith.constant 1.000000e+00 : f32
    %264 = vector.broadcast %cst_62 : f32 to vector<2x128xf32>
    %265 = arith.addf %264, %263 : vector<2x128xf32>
    %266 = arith.divf %264, %265 : vector<2x128xf32>
    %267 = vector.extract_strided_slice %254 {offsets = [0, 256], sizes = [2, 128], strides = [1, 1]} : vector<2x512xf32> to vector<2x128xf32>
    %268 = math.tanh %267 : vector<2x128xf32>
    %269 = vector.extract_strided_slice %254 {offsets = [0, 384], sizes = [2, 128], strides = [1, 1]} : vector<2x512xf32> to vector<2x128xf32>
    %270 = arith.negf %269 : vector<2x128xf32>
    %271 = math.exp %270 : vector<2x128xf32>
    %cst_63 = arith.constant 1.000000e+00 : f32
    %272 = vector.broadcast %cst_63 : f32 to vector<2x128xf32>
    %273 = arith.addf %272, %271 : vector<2x128xf32>
    %274 = arith.divf %272, %273 : vector<2x128xf32>
    %275 = arith.mulf %266, %237 : vector<2x128xf32>
    %276 = arith.mulf %260, %268 : vector<2x128xf32>
    %277 = arith.addf %275, %276 : vector<2x128xf32>
    %278 = math.tanh %277 : vector<2x128xf32>
    %279 = arith.mulf %274, %278 : vector<2x128xf32>
    %280 = vector.broadcast %3 : vector<1x128xf32> to vector<2x128xf32>
    %281 = arith.mulf %279, %280 : vector<2x128xf32>
    %cst_64 = arith.constant dense<0.000000e+00> : vector<2xf32>
    %282 = vector.multi_reduction <add>, %281, %cst_64 [1] : vector<2x128xf32> to vector<2xf32>
    %283 = vector.shape_cast %282 : vector<2xf32> to vector<2x1xf32>
    %284 = vector.broadcast %4 : vector<1x1xf32> to vector<2x1xf32>
    %285 = arith.addf %283, %284 : vector<2x1xf32>
    %c0_65 = arith.constant 0 : index
    %c6_66 = arith.constant 6 : index
    %286 = vector.load %arg6[%c0_65, %c6_66] : memref<2x12xf32, #tpu.memory_space<vmem>>, vector<2x1xf32>
    tpu.vector_store %arg6[%c0_65, %c6_66], %285 {strides = array<i32>} : memref<2x12xf32, #tpu.memory_space<vmem>>, vector<2x1xf32>,
    %c0_67 = arith.constant 0 : index
    %c7 = arith.constant 7 : index
    %287 = vector.load %arg0[%c0_67, %c7] : memref<2x8xf32, #tpu.memory_space<vmem>>, vector<2x1xf32>
    %cst_68 = arith.constant dense<0.000000e+00> : vector<2x512xf32>
    %288 = tpu.matmul %279, %0, %cst_68 {dimension_numbers = #tpu.dot_dimension_numbers<[1], [0], [0], [1], [0, 0, 1, 1], [], []>} : vector<2x128xf32>, vector<128x512xf32>, vector<2x512xf32> -> vector<2x512xf32>
    %289 = vector.broadcast %287 : vector<2x1xf32> to vector<2x512xf32>
    %290 = vector.broadcast %1 : vector<1x512xf32> to vector<2x512xf32>
    %291 = arith.mulf %289, %290 : vector<2x512xf32>
    %292 = arith.addf %288, %291 : vector<2x512xf32>
    %293 = vector.broadcast %2 : vector<1x512xf32> to vector<2x512xf32>
    %294 = arith.addf %292, %293 : vector<2x512xf32>
    %295 = vector.extract_strided_slice %294 {offsets = [0, 0], sizes = [2, 128], strides = [1, 1]} : vector<2x512xf32> to vector<2x128xf32>
    %296 = arith.negf %295 : vector<2x128xf32>
    %297 = math.exp %296 : vector<2x128xf32>
    %cst_69 = arith.constant 1.000000e+00 : f32
    %298 = vector.broadcast %cst_69 : f32 to vector<2x128xf32>
    %299 = arith.addf %298, %297 : vector<2x128xf32>
    %300 = arith.divf %298, %299 : vector<2x128xf32>
    %301 = vector.extract_strided_slice %294 {offsets = [0, 128], sizes = [2, 128], strides = [1, 1]} : vector<2x512xf32> to vector<2x128xf32>
    %302 = arith.negf %301 : vector<2x128xf32>
    %303 = math.exp %302 : vector<2x128xf32>
    %cst_70 = arith.constant 1.000000e+00 : f32
    %304 = vector.broadcast %cst_70 : f32 to vector<2x128xf32>
    %305 = arith.addf %304, %303 : vector<2x128xf32>
    %306 = arith.divf %304, %305 : vector<2x128xf32>
    %307 = vector.extract_strided_slice %294 {offsets = [0, 256], sizes = [2, 128], strides = [1, 1]} : vector<2x512xf32> to vector<2x128xf32>
    %308 = math.tanh %307 : vector<2x128xf32>
    %309 = vector.extract_strided_slice %294 {offsets = [0, 384], sizes = [2, 128], strides = [1, 1]} : vector<2x512xf32> to vector<2x128xf32>
    %310 = arith.negf %309 : vector<2x128xf32>
    %311 = math.exp %310 : vector<2x128xf32>
    %cst_71 = arith.constant 1.000000e+00 : f32
    %312 = vector.broadcast %cst_71 : f32 to vector<2x128xf32>
    %313 = arith.addf %312, %311 : vector<2x128xf32>
    %314 = arith.divf %312, %313 : vector<2x128xf32>
    %315 = arith.mulf %306, %277 : vector<2x128xf32>
    %316 = arith.mulf %300, %308 : vector<2x128xf32>
    %317 = arith.addf %315, %316 : vector<2x128xf32>
    %318 = math.tanh %317 : vector<2x128xf32>
    %319 = arith.mulf %314, %318 : vector<2x128xf32>
    %320 = vector.broadcast %3 : vector<1x128xf32> to vector<2x128xf32>
    %321 = arith.mulf %319, %320 : vector<2x128xf32>
    %cst_72 = arith.constant dense<0.000000e+00> : vector<2xf32>
    %322 = vector.multi_reduction <add>, %321, %cst_72 [1] : vector<2x128xf32> to vector<2xf32>
    %323 = vector.shape_cast %322 : vector<2xf32> to vector<2x1xf32>
    %324 = vector.broadcast %4 : vector<1x1xf32> to vector<2x1xf32>
    %325 = arith.addf %323, %324 : vector<2x1xf32>
    %c0_73 = arith.constant 0 : index
    %c7_74 = arith.constant 7 : index
    %326 = vector.load %arg6[%c0_73, %c7_74] : memref<2x12xf32, #tpu.memory_space<vmem>>, vector<2x1xf32>
    tpu.vector_store %arg6[%c0_73, %c7_74], %325 {strides = array<i32>} : memref<2x12xf32, #tpu.memory_space<vmem>>, vector<2x1xf32>,
    %cst_75 = arith.constant dense<0.000000e+00> : vector<2x512xf32>
    %327 = tpu.matmul %319, %0, %cst_75 {dimension_numbers = #tpu.dot_dimension_numbers<[1], [0], [0], [1], [0, 0, 1, 1], [], []>} : vector<2x128xf32>, vector<128x512xf32>, vector<2x512xf32> -> vector<2x512xf32>
    %328 = vector.broadcast %325 : vector<2x1xf32> to vector<2x512xf32>
    %329 = vector.broadcast %1 : vector<1x512xf32> to vector<2x512xf32>
    %330 = arith.mulf %328, %329 : vector<2x512xf32>
    %331 = arith.addf %327, %330 : vector<2x512xf32>
    %332 = vector.broadcast %2 : vector<1x512xf32> to vector<2x512xf32>
    %333 = arith.addf %331, %332 : vector<2x512xf32>
    %334 = vector.extract_strided_slice %333 {offsets = [0, 0], sizes = [2, 128], strides = [1, 1]} : vector<2x512xf32> to vector<2x128xf32>
    %335 = arith.negf %334 : vector<2x128xf32>
    %336 = math.exp %335 : vector<2x128xf32>
    %cst_76 = arith.constant 1.000000e+00 : f32
    %337 = vector.broadcast %cst_76 : f32 to vector<2x128xf32>
    %338 = arith.addf %337, %336 : vector<2x128xf32>
    %339 = arith.divf %337, %338 : vector<2x128xf32>
    %340 = vector.extract_strided_slice %333 {offsets = [0, 128], sizes = [2, 128], strides = [1, 1]} : vector<2x512xf32> to vector<2x128xf32>
    %341 = arith.negf %340 : vector<2x128xf32>
    %342 = math.exp %341 : vector<2x128xf32>
    %cst_77 = arith.constant 1.000000e+00 : f32
    %343 = vector.broadcast %cst_77 : f32 to vector<2x128xf32>
    %344 = arith.addf %343, %342 : vector<2x128xf32>
    %345 = arith.divf %343, %344 : vector<2x128xf32>
    %346 = vector.extract_strided_slice %333 {offsets = [0, 256], sizes = [2, 128], strides = [1, 1]} : vector<2x512xf32> to vector<2x128xf32>
    %347 = math.tanh %346 : vector<2x128xf32>
    %348 = vector.extract_strided_slice %333 {offsets = [0, 384], sizes = [2, 128], strides = [1, 1]} : vector<2x512xf32> to vector<2x128xf32>
    %349 = arith.negf %348 : vector<2x128xf32>
    %350 = math.exp %349 : vector<2x128xf32>
    %cst_78 = arith.constant 1.000000e+00 : f32
    %351 = vector.broadcast %cst_78 : f32 to vector<2x128xf32>
    %352 = arith.addf %351, %350 : vector<2x128xf32>
    %353 = arith.divf %351, %352 : vector<2x128xf32>
    %354 = arith.mulf %345, %317 : vector<2x128xf32>
    %355 = arith.mulf %339, %347 : vector<2x128xf32>
    %356 = arith.addf %354, %355 : vector<2x128xf32>
    %357 = math.tanh %356 : vector<2x128xf32>
    %358 = arith.mulf %353, %357 : vector<2x128xf32>
    %359 = vector.broadcast %3 : vector<1x128xf32> to vector<2x128xf32>
    %360 = arith.mulf %358, %359 : vector<2x128xf32>
    %cst_79 = arith.constant dense<0.000000e+00> : vector<2xf32>
    %361 = vector.multi_reduction <add>, %360, %cst_79 [1] : vector<2x128xf32> to vector<2xf32>
    %362 = vector.shape_cast %361 : vector<2xf32> to vector<2x1xf32>
    %363 = vector.broadcast %4 : vector<1x1xf32> to vector<2x1xf32>
    %364 = arith.addf %362, %363 : vector<2x1xf32>
    %c0_80 = arith.constant 0 : index
    %c8 = arith.constant 8 : index
    %365 = vector.load %arg6[%c0_80, %c8] : memref<2x12xf32, #tpu.memory_space<vmem>>, vector<2x1xf32>
    tpu.vector_store %arg6[%c0_80, %c8], %364 {strides = array<i32>} : memref<2x12xf32, #tpu.memory_space<vmem>>, vector<2x1xf32>,
    %cst_81 = arith.constant dense<0.000000e+00> : vector<2x512xf32>
    %366 = tpu.matmul %358, %0, %cst_81 {dimension_numbers = #tpu.dot_dimension_numbers<[1], [0], [0], [1], [0, 0, 1, 1], [], []>} : vector<2x128xf32>, vector<128x512xf32>, vector<2x512xf32> -> vector<2x512xf32>
    %367 = vector.broadcast %364 : vector<2x1xf32> to vector<2x512xf32>
    %368 = vector.broadcast %1 : vector<1x512xf32> to vector<2x512xf32>
    %369 = arith.mulf %367, %368 : vector<2x512xf32>
    %370 = arith.addf %366, %369 : vector<2x512xf32>
    %371 = vector.broadcast %2 : vector<1x512xf32> to vector<2x512xf32>
    %372 = arith.addf %370, %371 : vector<2x512xf32>
    %373 = vector.extract_strided_slice %372 {offsets = [0, 0], sizes = [2, 128], strides = [1, 1]} : vector<2x512xf32> to vector<2x128xf32>
    %374 = arith.negf %373 : vector<2x128xf32>
    %375 = math.exp %374 : vector<2x128xf32>
    %cst_82 = arith.constant 1.000000e+00 : f32
    %376 = vector.broadcast %cst_82 : f32 to vector<2x128xf32>
    %377 = arith.addf %376, %375 : vector<2x128xf32>
    %378 = arith.divf %376, %377 : vector<2x128xf32>
    %379 = vector.extract_strided_slice %372 {offsets = [0, 128], sizes = [2, 128], strides = [1, 1]} : vector<2x512xf32> to vector<2x128xf32>
    %380 = arith.negf %379 : vector<2x128xf32>
    %381 = math.exp %380 : vector<2x128xf32>
    %cst_83 = arith.constant 1.000000e+00 : f32
    %382 = vector.broadcast %cst_83 : f32 to vector<2x128xf32>
    %383 = arith.addf %382, %381 : vector<2x128xf32>
    %384 = arith.divf %382, %383 : vector<2x128xf32>
    %385 = vector.extract_strided_slice %372 {offsets = [0, 256], sizes = [2, 128], strides = [1, 1]} : vector<2x512xf32> to vector<2x128xf32>
    %386 = math.tanh %385 : vector<2x128xf32>
    %387 = vector.extract_strided_slice %372 {offsets = [0, 384], sizes = [2, 128], strides = [1, 1]} : vector<2x512xf32> to vector<2x128xf32>
    %388 = arith.negf %387 : vector<2x128xf32>
    %389 = math.exp %388 : vector<2x128xf32>
    %cst_84 = arith.constant 1.000000e+00 : f32
    %390 = vector.broadcast %cst_84 : f32 to vector<2x128xf32>
    %391 = arith.addf %390, %389 : vector<2x128xf32>
    %392 = arith.divf %390, %391 : vector<2x128xf32>
    %393 = arith.mulf %384, %356 : vector<2x128xf32>
    %394 = arith.mulf %378, %386 : vector<2x128xf32>
    %395 = arith.addf %393, %394 : vector<2x128xf32>
    %396 = math.tanh %395 : vector<2x128xf32>
    %397 = arith.mulf %392, %396 : vector<2x128xf32>
    %398 = vector.broadcast %3 : vector<1x128xf32> to vector<2x128xf32>
    %399 = arith.mulf %397, %398 : vector<2x128xf32>
    %cst_85 = arith.constant dense<0.000000e+00> : vector<2xf32>
    %400 = vector.multi_reduction <add>, %399, %cst_85 [1] : vector<2x128xf32> to vector<2xf32>
    %401 = vector.shape_cast %400 : vector<2xf32> to vector<2x1xf32>
    %402 = vector.broadcast %4 : vector<1x1xf32> to vector<2x1xf32>
    %403 = arith.addf %401, %402 : vector<2x1xf32>
    %c0_86 = arith.constant 0 : index
    %c9 = arith.constant 9 : index
    %404 = vector.load %arg6[%c0_86, %c9] : memref<2x12xf32, #tpu.memory_space<vmem>>, vector<2x1xf32>
    tpu.vector_store %arg6[%c0_86, %c9], %403 {strides = array<i32>} : memref<2x12xf32, #tpu.memory_space<vmem>>, vector<2x1xf32>,
    %cst_87 = arith.constant dense<0.000000e+00> : vector<2x512xf32>
    %405 = tpu.matmul %397, %0, %cst_87 {dimension_numbers = #tpu.dot_dimension_numbers<[1], [0], [0], [1], [0, 0, 1, 1], [], []>} : vector<2x128xf32>, vector<128x512xf32>, vector<2x512xf32> -> vector<2x512xf32>
    %406 = vector.broadcast %403 : vector<2x1xf32> to vector<2x512xf32>
    %407 = vector.broadcast %1 : vector<1x512xf32> to vector<2x512xf32>
    %408 = arith.mulf %406, %407 : vector<2x512xf32>
    %409 = arith.addf %405, %408 : vector<2x512xf32>
    %410 = vector.broadcast %2 : vector<1x512xf32> to vector<2x512xf32>
    %411 = arith.addf %409, %410 : vector<2x512xf32>
    %412 = vector.extract_strided_slice %411 {offsets = [0, 0], sizes = [2, 128], strides = [1, 1]} : vector<2x512xf32> to vector<2x128xf32>
    %413 = arith.negf %412 : vector<2x128xf32>
    %414 = math.exp %413 : vector<2x128xf32>
    %cst_88 = arith.constant 1.000000e+00 : f32
    %415 = vector.broadcast %cst_88 : f32 to vector<2x128xf32>
    %416 = arith.addf %415, %414 : vector<2x128xf32>
    %417 = arith.divf %415, %416 : vector<2x128xf32>
    %418 = vector.extract_strided_slice %411 {offsets = [0, 128], sizes = [2, 128], strides = [1, 1]} : vector<2x512xf32> to vector<2x128xf32>
    %419 = arith.negf %418 : vector<2x128xf32>
    %420 = math.exp %419 : vector<2x128xf32>
    %cst_89 = arith.constant 1.000000e+00 : f32
    %421 = vector.broadcast %cst_89 : f32 to vector<2x128xf32>
    %422 = arith.addf %421, %420 : vector<2x128xf32>
    %423 = arith.divf %421, %422 : vector<2x128xf32>
    %424 = vector.extract_strided_slice %411 {offsets = [0, 256], sizes = [2, 128], strides = [1, 1]} : vector<2x512xf32> to vector<2x128xf32>
    %425 = math.tanh %424 : vector<2x128xf32>
    %426 = vector.extract_strided_slice %411 {offsets = [0, 384], sizes = [2, 128], strides = [1, 1]} : vector<2x512xf32> to vector<2x128xf32>
    %427 = arith.negf %426 : vector<2x128xf32>
    %428 = math.exp %427 : vector<2x128xf32>
    %cst_90 = arith.constant 1.000000e+00 : f32
    %429 = vector.broadcast %cst_90 : f32 to vector<2x128xf32>
    %430 = arith.addf %429, %428 : vector<2x128xf32>
    %431 = arith.divf %429, %430 : vector<2x128xf32>
    %432 = arith.mulf %423, %395 : vector<2x128xf32>
    %433 = arith.mulf %417, %425 : vector<2x128xf32>
    %434 = arith.addf %432, %433 : vector<2x128xf32>
    %435 = math.tanh %434 : vector<2x128xf32>
    %436 = arith.mulf %431, %435 : vector<2x128xf32>
    %437 = vector.broadcast %3 : vector<1x128xf32> to vector<2x128xf32>
    %438 = arith.mulf %436, %437 : vector<2x128xf32>
    %cst_91 = arith.constant dense<0.000000e+00> : vector<2xf32>
    %439 = vector.multi_reduction <add>, %438, %cst_91 [1] : vector<2x128xf32> to vector<2xf32>
    %440 = vector.shape_cast %439 : vector<2xf32> to vector<2x1xf32>
    %441 = vector.broadcast %4 : vector<1x1xf32> to vector<2x1xf32>
    %442 = arith.addf %440, %441 : vector<2x1xf32>
    %c0_92 = arith.constant 0 : index
    %c10 = arith.constant 10 : index
    %443 = vector.load %arg6[%c0_92, %c10] : memref<2x12xf32, #tpu.memory_space<vmem>>, vector<2x1xf32>
    tpu.vector_store %arg6[%c0_92, %c10], %442 {strides = array<i32>} : memref<2x12xf32, #tpu.memory_space<vmem>>, vector<2x1xf32>,
    %cst_93 = arith.constant dense<0.000000e+00> : vector<2x512xf32>
    %444 = tpu.matmul %436, %0, %cst_93 {dimension_numbers = #tpu.dot_dimension_numbers<[1], [0], [0], [1], [0, 0, 1, 1], [], []>} : vector<2x128xf32>, vector<128x512xf32>, vector<2x512xf32> -> vector<2x512xf32>
    %445 = vector.broadcast %442 : vector<2x1xf32> to vector<2x512xf32>
    %446 = vector.broadcast %1 : vector<1x512xf32> to vector<2x512xf32>
    %447 = arith.mulf %445, %446 : vector<2x512xf32>
    %448 = arith.addf %444, %447 : vector<2x512xf32>
    %449 = vector.broadcast %2 : vector<1x512xf32> to vector<2x512xf32>
    %450 = arith.addf %448, %449 : vector<2x512xf32>
    %451 = vector.extract_strided_slice %450 {offsets = [0, 0], sizes = [2, 128], strides = [1, 1]} : vector<2x512xf32> to vector<2x128xf32>
    %452 = arith.negf %451 : vector<2x128xf32>
    %453 = math.exp %452 : vector<2x128xf32>
    %cst_94 = arith.constant 1.000000e+00 : f32
    %454 = vector.broadcast %cst_94 : f32 to vector<2x128xf32>
    %455 = arith.addf %454, %453 : vector<2x128xf32>
    %456 = arith.divf %454, %455 : vector<2x128xf32>
    %457 = vector.extract_strided_slice %450 {offsets = [0, 128], sizes = [2, 128], strides = [1, 1]} : vector<2x512xf32> to vector<2x128xf32>
    %458 = arith.negf %457 : vector<2x128xf32>
    %459 = math.exp %458 : vector<2x128xf32>
    %cst_95 = arith.constant 1.000000e+00 : f32
    %460 = vector.broadcast %cst_95 : f32 to vector<2x128xf32>
    %461 = arith.addf %460, %459 : vector<2x128xf32>
    %462 = arith.divf %460, %461 : vector<2x128xf32>
    %463 = vector.extract_strided_slice %450 {offsets = [0, 256], sizes = [2, 128], strides = [1, 1]} : vector<2x512xf32> to vector<2x128xf32>
    %464 = math.tanh %463 : vector<2x128xf32>
    %465 = vector.extract_strided_slice %450 {offsets = [0, 384], sizes = [2, 128], strides = [1, 1]} : vector<2x512xf32> to vector<2x128xf32>
    %466 = arith.negf %465 : vector<2x128xf32>
    %467 = math.exp %466 : vector<2x128xf32>
    %cst_96 = arith.constant 1.000000e+00 : f32
    %468 = vector.broadcast %cst_96 : f32 to vector<2x128xf32>
    %469 = arith.addf %468, %467 : vector<2x128xf32>
    %470 = arith.divf %468, %469 : vector<2x128xf32>
    %471 = arith.mulf %462, %434 : vector<2x128xf32>
    %472 = arith.mulf %456, %464 : vector<2x128xf32>
    %473 = arith.addf %471, %472 : vector<2x128xf32>
    %474 = math.tanh %473 : vector<2x128xf32>
    %475 = arith.mulf %470, %474 : vector<2x128xf32>
    %476 = vector.broadcast %3 : vector<1x128xf32> to vector<2x128xf32>
    %477 = arith.mulf %475, %476 : vector<2x128xf32>
    %cst_97 = arith.constant dense<0.000000e+00> : vector<2xf32>
    %478 = vector.multi_reduction <add>, %477, %cst_97 [1] : vector<2x128xf32> to vector<2xf32>
    %479 = vector.shape_cast %478 : vector<2xf32> to vector<2x1xf32>
    %480 = vector.broadcast %4 : vector<1x1xf32> to vector<2x1xf32>
    %481 = arith.addf %479, %480 : vector<2x1xf32>
    %c0_98 = arith.constant 0 : index
    %c11 = arith.constant 11 : index
    %482 = vector.load %arg6[%c0_98, %c11] : memref<2x12xf32, #tpu.memory_space<vmem>>, vector<2x1xf32>
    tpu.vector_store %arg6[%c0_98, %c11], %481 {strides = array<i32>} : memref<2x12xf32, #tpu.memory_space<vmem>>, vector<2x1xf32>,
    return
  }
}

</mosaic_0001>

<bundles_post_ra>
// kernel: tpu_custom_call.1
= control target key start
LH: loop header
LB: loop body
LE: loop exit
PB: predicated region body
PF: predicated region fallthrough
CT: control target
= control target key end

     0   :  { %s4381_s0 = inlined_call_operand.vmem [shape: f32[2,8], index: 0, kind: input, shape index: {}]   ;;  %s4382_s1 = inlined_call_operand.hbm [shape: f32[128,512], index: 1, kind: input, shape index: {}]   ;;  %s4383_s2 = inlined_call_operand.vmem [shape: f32[1,512], index: 2, kind: input, shape index: {}]   ;;  %s4384_s3 = inlined_call_operand.vmem [shape: f32[1,512], index: 3, kind: input, shape index: {}]   ;;  %s4385_s4 = inlined_call_operand.vmem [shape: f32[1,128], index: 4, kind: input, shape index: {}]   ;;  %s4386_s5 = inlined_call_operand.<no memory space> [shape: f32[1,1], index: 5, kind: input, shape index: {}]   ;;  %s4387_s6 = inlined_call_operand.hbm [shape: f32[2,12], index: 6, kind: output, shape index: {}]  }
   0x1   :  { %v11_v0 = vstv %s4386_s5 }
   0x2   :  { %12 = vst [vmem:[#allocation2] sm:$0x1] %v11_v0 }
   0x3   :  { %13 = vsyncpa [#allocation4], 0 }
   0x4   :  { %14 = vsyncpa [#allocation5], 0  ;;  %s3538_s23 = smov [#allocation3]   ;;  %s3490_s27 = scalar_lea.hbm %s4382_s1, 8192 }
   0x5   :  { %s22_s24 = sshll.u32 %s3538_s23, 4  ;;  %p3491_p0 = scmp.ne.s32.totalorder %s4382_s1, %s3490_s27  ;;  %s23_s24 = int_to_ptr.vmem [resolvable:$true] %s22_s24 }
   0x6   :  { %p3494_p1 = scmp.lt.u32.totalorder %s3490_s27, %s4382_s1 }
   0x8   :  { %p3496_p2 = pnand %p3494_p1, %p3491_p0 }
   0xa   :  { %3499 = shalt.err (!%p3496_p2)
}
   0xb   :  { %s3500_s5 = scalar_lea.vmem %s23_s24, 8192  ;;  %p3505_p4 = scmp.lt.s32.totalorder %s23_s24, %s23_s24 }
   0xc   :  { %p3501_p3 = scmp.ne.s32.totalorder %s23_s24, %s3500_s5  ;;  %p3506_p5 = scmp.lt.s32.totalorder %s3500_s5, %s3500_s5 }
   0xe   :  { %p3507_p6 = por %p3506_p5, %p3505_p4 }
  0x10   :  { %p3508_p7 = pnand %p3507_p6, %p3501_p3 }
  0x12   :  { %3511 = shalt.err (!%p3508_p7)
}
  0x13   :  { %s3539_s8 = smov 512   ;;  %s3540_s9 = smov 32  }
  0x14   :  { %28 = dma.hbm_to_vmem [thread:$0]  %s4382_s1, 8192, %s23_s24, [#allocation4], %s3539_s8, %s3539_s8, %s3540_s9  }
  0x15   :  { %3534 = dma.done.wait [#allocation4], 8192  }
  0x16   :  { %3535 = vsyncadd [#allocation4], 4294959104  ;;  %v4390_v1 = vmov 0.0   ;;  %v4388_v2 = vmov 0   ;;  %v41_v3 = vld [vmem:[#allocation3 + $0x8] sm:$0xff]  ;;  %v43_v5 = vld [vmem:[#allocation3 + $0x18] sm:$0xff] }
  0x17   :  { %203 = vmatprep.mubr.f32.mxu0 %v4390_v1  ;;  %274 = vmatprep.mubr.f32.mxu1 %v4390_v1  ;;  %v45_v4 = vld [vmem:[#allocation3 + $0x28] sm:$0xff]  ;;  %v47_v7 = vld [vmem:[#allocation3 + $0x38] sm:$0xff]  ;;  %v40_v8 = vld [vmem:[#allocation3] sm:$0xff]  ;;  %vm337_vm0 = vcmask 1041408   ;;  %vm348_vm1 = vcmask 1024   ;;  %vm539_vm2 = vcmask 9224  }
  0x18   :  { %3288 = vset.pattern.permute.xlu0 %v4388_v2  ;;  %v3615_v6 = vpack.c.bf16 %v45_v4, %v41_v3  ;;  %v44_v9 = vld [vmem:[#allocation3 + $0x20] sm:$0xff]  ;;  %v3617_v10 = vpack.c.bf16 %v47_v7, %v43_v5  ;;  %v42_v12 = vld [vmem:[#allocation3 + $0x10] sm:$0xff]  ;;  %v49_v14 = vld [vmem:[#allocation3 + $0x48] sm:$0xff]  ;;  %s3551_s30 = smov 2   ;;  %s3552_s7 = smov 3   ;;  %vm730_vm3 = vcmask 17424  }
  0x19   :  { %v3619_v11 = vpack.c.bf16 %v44_v9, %v40_v8  ;;  %v46_v13 = vld [vmem:[#allocation3 + $0x30] sm:$0xff]  ;;  %v53_v16 = vld [vmem:[#allocation3 + $0x68] sm:$0xff]  ;;  %v51_v17 = vld [vmem:[#allocation3 + $0x58] sm:$0xff]  ;;  %s3553_s5 = smov 5   ;;  %s3554_s8 = smov 6   ;;  %vm921_vm4 = vcmask 25624  }
  0x1a   :  { %2497 = vmatprep.subr.bf16.mxu0 %v3615_v6  ;;  %v3622_v15 = vpack.c.bf16 %v46_v13, %v42_v12  ;;  %v55_v18 = vld [vmem:[#allocation3 + $0x78] sm:$0xff]  ;;  %2529 = vmatprep.subr.bf16.mxu1 %v3617_v10  ;;  %v3626_v19 = vpack.c.bf16 %v53_v16, %v49_v14  ;;  %v48_v21 = vld [vmem:[#allocation3 + $0x40] sm:$0xff]  ;;  %v50_v23 = vld [vmem:[#allocation3 + $0x50] sm:$0xff]  ;;  %s3555_s9 = smov 8   ;;  %s3556_s10 = smov 10   ;;  %vm1112_vm5 = vcmask 33824  }
  0x1b   :  { %2499 = vmatpush1.bf16.msra.mxu0 %v3619_v11  ;;  %v3628_v20 = vpack.c.bf16 %v55_v18, %v51_v17  ;;  %v52_v22 = vld [vmem:[#allocation3 + $0x60] sm:$0xff]  ;;  %v54_v25 = vld [vmem:[#allocation3 + $0x70] sm:$0xff]  ;;  %v57_v26 = vld [vmem:[#allocation3 + $0x88] sm:$0xff]  ;;  %s3557_s11 = smov 4   ;;  %s3558_s1 = smov 7   ;;  %vm1303_vm6 = vcmask 42024  }
  0x1c   :  { %2531 = vmatpush1.bf16.msra.mxu1 %v3622_v15  ;;  %v3631_v24 = vpack.c.bf16 %v52_v22, %v48_v21  ;;  %v61_v27 = vld [vmem:[#allocation3 + $0xa8] sm:$0xff]  ;;  %2501 = vmatprep.subr.bf16.mxu0 %v3626_v19  ;;  %v3635_v28 = vpack.c.bf16 %v54_v25, %v50_v23  ;;  %v59_v30 = vld [vmem:[#allocation3 + $0x98] sm:$0xff]  ;;  %v56_v32 = vld [vmem:[#allocation3 + $0x80] sm:$0xff]  ;;  %s3559_s12 = smov 9   ;;  %s3560_s13 = smov 11   ;;  %vm1494_vm7 = vcmask 50224  }
  0x1d   :  { %2533 = vmatprep.subr.bf16.mxu1 %v3628_v20  ;;  %v3637_v29 = vpack.c.bf16 %v61_v27, %v57_v26  ;;  %v63_v31 = vld [vmem:[#allocation3 + $0xb8] sm:$0xff]  ;;  %v60_v34 = vld [vmem:[#allocation3 + $0xa0] sm:$0xff]  ;;  %v58_v35 = vld [vmem:[#allocation3 + $0x90] sm:$0xff]  ;;  %vm1685_vm8 = vcmask 58424   ;;  %vm1874_vm9 = vcmask 66624   ;;  %vm2063_vm10 = vcmask 74824  }
  0x1e   :  { %v3639_v33 = vpack.c.bf16 %v63_v31, %v59_v30  ;;  %v62_v36 = vld [vmem:[#allocation3 + $0xb0] sm:$0xff]  ;;  %v3642_v37 = vpack.c.bf16 %v60_v34, %v56_v32  ;;  %v65_v38 = vld [vmem:[#allocation3 + $0xc8] sm:$0xff]  ;;  %v67_v40 = vld [vmem:[#allocation3 + $0xd8] sm:$0xff]  ;;  %vm2252_vm11 = vcmask 83024   ;;  %s3561_s14 = smov [#allocation6]   ;;  %vm2441_vm12 = vcmask 91224  }
  0x1f   :  { %2503 = vmatpush1.bf16.msra.mxu0 %v3631_v24  ;;  %v69_v39 = vld [vmem:[#allocation3 + $0xe8] sm:$0xff]  ;;  %v3646_v41 = vpack.c.bf16 %v62_v36, %v58_v35  ;;  %v71_v43 = vld [vmem:[#allocation3 + $0xf8] sm:$0xff]  ;;  %v64_v44 = vld [vmem:[#allocation3 + $0xc0] sm:$0xff]  ;;  %s2449_s15 = sshll.u32 %s3561_s14, 4  ;;  %s2450_s15 = int_to_ptr.vmem [resolvable:$true] %s2449_s15 }
  0x20   :  { %2535 = vmatpush1.bf16.msra.mxu1 %v3635_v28  ;;  %2505 = vmatprep.subr.bf16.mxu0 %v3637_v29  ;;  %v3648_v42 = vpack.c.bf16 %v69_v39, %v65_v38  ;;  %v68_v45 = vld [vmem:[#allocation3 + $0xe0] sm:$0xff]  ;;  %v3651_v46 = vpack.c.bf16 %v71_v43, %v67_v40  ;;  %v66_v47 = vld [vmem:[#allocation3 + $0xd0] sm:$0xff]  ;;  %v73_v49 = vld [vmem:[#allocation3 + $0x108] sm:$0xff]  ;;  %s3512_s16 = scalar_lea.vmem %s2450_s15, 32  ;;  %p3517_p9 = scmp.lt.s32.totalorder %s2450_s15, %s2450_s15 }
  0x21   :  { %2537 = vmatprep.subr.bf16.mxu1 %v3639_v33  ;;  %v70_v48 = vld [vmem:[#allocation3 + $0xf0] sm:$0xff]  ;;  %v77_v50 = vld [vmem:[#allocation3 + $0x128] sm:$0xff]  ;;  %v75_v51 = vld [vmem:[#allocation3 + $0x118] sm:$0xff]  ;;  %v3654_v53 = vpack.c.bf16 %v68_v45, %v64_v44  ;;  %p3513_p8 = scmp.ne.s32.totalorder %s2450_s15, %s3512_s16  ;;  %p3518_p10 = scmp.lt.s32.totalorder %s3512_s16, %s3512_s16 }
  0x22   :  { %v79_v52 = vld [vmem:[#allocation3 + $0x138] sm:$0xff]  ;;  %v3658_v54 = vpack.c.bf16 %v70_v48, %v66_v47  ;;  %v3660_v55 = vpack.c.bf16 %v77_v50, %v73_v49  ;;  %v72_v56 = vld [vmem:[#allocation3 + $0x100] sm:$0xff]  ;;  %v74_v58 = vld [vmem:[#allocation3 + $0x110] sm:$0xff] }
  0x23   :  { %2507 = vmatpush1.bf16.msra.mxu0 %v3642_v37  ;;  %v76_v57 = vld [vmem:[#allocation3 + $0x120] sm:$0xff]  ;;  %v3663_v59 = vpack.c.bf16 %v79_v52, %v75_v51  ;;  %v78_v60 = vld [vmem:[#allocation3 + $0x130] sm:$0xff]  ;;  %v81_v61 = vld [vmem:[#allocation3 + $0x148] sm:$0xff]  ;;  %p3519_p11 = por %p3518_p10, %p3517_p9 }
  0x24   :  { %2539 = vmatpush1.bf16.msra.mxu1 %v3646_v41  ;;  %2509 = vmatprep.subr.bf16.mxu0 %v3648_v42  ;;  %v85_v62 = vld [vmem:[#allocation3 + $0x168] sm:$0xff]  ;;  %v83_v63 = vld [vmem:[#allocation3 + $0x158] sm:$0xff]  ;;  %v3666_v3 = vpack.c.bf16 %v76_v57, %v72_v56  ;;  %v3670_v4 = vpack.c.bf16 %v78_v60, %v74_v58  ;;  %v80_v7 = vld [vmem:[#allocation3 + $0x140] sm:$0xff]  ;;  %v3543_v56 = vmov 1   ;;  %v115_v57 = vlaneseq }
  0x25   :  { %2541 = vmatprep.subr.bf16.mxu1 %v3651_v46  ;;  %v87_v0 = vld [vmem:[#allocation3 + $0x178] sm:$0xff]  ;;  %v3672_v5 = vpack.c.bf16 %v85_v62, %v81_v61  ;;  %v84_v8 = vld [vmem:[#allocation3 + $0x160] sm:$0xff]  ;;  %v82_v9 = vld [vmem:[#allocation3 + $0x150] sm:$0xff]  ;;  %p3520_p12 = pnand %p3519_p11, %p3513_p8 }
  0x26   :  { %v3675_v12 = vpack.c.bf16 %v87_v0, %v83_v63  ;;  %v86_v13 = vld [vmem:[#allocation3 + $0x170] sm:$0xff]  ;;  %v89_v14 = vld [vmem:[#allocation3 + $0x188] sm:$0xff]  ;;  %v91_v17 = vld [vmem:[#allocation3 + $0x198] sm:$0xff]  ;;  %v3678_v21 = vpack.c.bf16 %v84_v8, %v80_v7  ;;  %v116_v58 = vshrl.u32 %v115_v57, 7 }
  0x27   :  { %2511 = vmatpush1.bf16.msra.mxu0 %v3654_v53  ;;  %v93_v16 = vld [vmem:[#allocation3 + $0x1a8] sm:$0xff]  ;;  %v95_v18 = vld [vmem:[#allocation3 + $0x1b8] sm:$0xff]  ;;  %v88_v22 = vld [vmem:[#allocation3 + $0x180] sm:$0xff]  ;;  %v3682_v23 = vpack.c.bf16 %v86_v13, %v82_v9 }
  0x28   :  { %2543 = vmatpush1.bf16.msra.mxu1 %v3658_v54  ;;  %2513 = vmatprep.subr.bf16.mxu0 %v3660_v55  ;;  %v3684_v25 = vpack.c.bf16 %v93_v16, %v89_v14  ;;  %v92_v26 = vld [vmem:[#allocation3 + $0x1a0] sm:$0xff]  ;;  %v90_v27 = vld [vmem:[#allocation3 + $0x190] sm:$0xff]  ;;  %v3690_v31 = vpack.c.bf16 %v95_v18, %v91_v17  ;;  %v97_v34 = vld [vmem:[#allocation3 + $0x1c8] sm:$0xff]  ;;  %v117_v60 = vsub.s32 0, %v116_v58  ;;  %v121_v62 = vsub.s32 1, %v116_v58 }
  0x29   :  { %2545 = vmatprep.subr.bf16.mxu1 %v3663_v59  ;;  %v108_v30 = vld [vmem:[%s4381_s0] sm:$0x3]  ;;  %v94_v32 = vld [vmem:[#allocation3 + $0x1b0] sm:$0xff]  ;;  %v101_v35 = vld [vmem:[#allocation3 + $0x1e8] sm:$0xff]  ;;  %v3693_v39 = vpack.c.bf16 %v92_v26, %v88_v22  ;;  %v129_v8 = vsub.s32 3, %v116_v58  ;;  %v125_v18 = vsub.s32 2, %v116_v58 }
  0x2a   :  { %111 = vperm.xlu0 %3288, %v108_v30   ;;  %v99_v36 = vld [vmem:[#allocation3 + $0x1d8] sm:$0xff]  ;;  %v3697_v40 = vpack.c.bf16 %v94_v32, %v90_v27  ;;  %v3699_v43 = vpack.c.bf16 %v101_v35, %v97_v34  ;;  %v96_v44 = vld [vmem:[#allocation3 + $0x1c0] sm:$0xff]  ;;  %v98_v48 = vld [vmem:[#allocation3 + $0x1d0] sm:$0xff] }
  0x2b   :  { %2515 = vmatpush1.bf16.msra.mxu0 %v3666_v3  ;;  %v103_v38 = vld [vmem:[#allocation3 + $0x1f8] sm:$0xff]  ;;  %v100_v45 = vld [vmem:[#allocation3 + $0x1e0] sm:$0xff]  ;;  %v102_v49 = vld [vmem:[#allocation3 + $0x1f0] sm:$0xff] }
  0x2c   :  { %2547 = vmatpush1.bf16.msra.mxu1 %v3670_v4  ;;  %2517 = vmatprep.subr.bf16.mxu0 %v3672_v5  ;;  %v3702_v47 = vpack.c.bf16 %v103_v38, %v99_v36  ;;  %v3705_v50 = vpack.c.bf16 %v100_v45, %v96_v44  ;;  %v3709_v51 = vpack.c.bf16 %v102_v49, %v98_v48  ;;  %v350_v52 = vld [vmem:[%s4381_s0] sm:$0x3] }
  0x2d   :  { %2549 = vmatprep.subr.bf16.mxu1 %v3675_v12  ;;  %v104_v61 = vld [vmem:[%s4383_s2] sm:$0xf] }
  0x2e   :  { %3289 = vset.pattern.permute.xlu0 %v3543_v56  ;;  %v3758_v63 = vrot.slane %v104_v61, %v117_v60  ;;  %v3760_v7 = vrot.slane %v104_v61, %v121_v62  ;;  %v105_v9 = vld [vmem:[%s4384_s3] sm:$0xf]  ;;  %v3767_v16 = vrot.slane %v104_v61, %v129_v8  ;;  %v3775_v44 = vrot.slane %v104_v61, %v125_v18 }
  0x2f   :  { %2519 = vmatpush1.bf16.msra.mxu0 %v3678_v21  ;;  %353 = vperm.xlu0 %3289, %v350_v52   ;;  %v3769_v17 = vrot.slane %v105_v9, %v117_v60  ;;  %v3771_v26 = vrot.slane %v105_v9, %v121_v62  ;;  %v3778_v56 = vrot.slane %v105_v9, %v129_v8 }
  0x30   :  { %2551 = vmatpush1.bf16.msra.mxu1 %v3682_v23  ;;  %2521 = vmatprep.subr.bf16.mxu0 %v3684_v25  ;;  %v3782_v62 = vrot.slane %v105_v9, %v125_v18 }
  0x31   :  { %2553 = vmatprep.subr.bf16.mxu1 %v3690_v31 }
  0x33   :  { %2523 = vmatpush1.bf16.msra.mxu0 %v3693_v39 }
  0x34   :  { %2555 = vmatpush1.bf16.msra.mxu1 %v3697_v40  ;;  %2525 = vmatprep.subr.bf16.mxu0 %v3699_v43 }
  0x35   :  { %2557 = vmatprep.subr.bf16.mxu1 %v3702_v47 }
  0x37   :  { %2527 = vmatpush1.bf16.msra.mxu0 %v3705_v50 }
  0x38   :  { %2559 = vmatpush1.bf16.msra.mxu1 %v3709_v51  ;;  %2561 = vmatprep.subr.bf16.mxu0 %v3615_v6 }
  0x39   :  { %2593 = vmatprep.subr.bf16.mxu1 %v3617_v10 }
  0x3a   :  { %204 = vmatmul.mubr.f32.vlgmr.msra.gmra.mrb[0].mxu0 %v4390_v1 }
  0x3b   :  { %275 = vmatmul.mubr.f32.vlgmr.msra.gmra.mrb[0].mxu1 %v4390_v1  ;;  %2563 = vmatpush1.bf16.msra.mxu0 %v3619_v11 }
  0x3c   :  { %2595 = vmatpush1.bf16.msra.mxu1 %v3622_v15  ;;  %2565 = vmatprep.subr.bf16.mxu0 %v3626_v19 }
  0x3d   :  { %2597 = vmatprep.subr.bf16.mxu1 %v3628_v20  ;;  %424 = vmatprep.mubr.f32.mxu0 %v4390_v1 }
  0x3e   :  { %495 = vmatprep.mubr.f32.mxu1 %v4390_v1 }
  0x3f   :  { %2567 = vmatpush1.bf16.msra.mxu0 %v3631_v24 }
  0x40   :  { %2599 = vmatpush1.bf16.msra.mxu1 %v3635_v28  ;;  %2569 = vmatprep.subr.bf16.mxu0 %v3637_v29 }
  0x41   :  { %2601 = vmatprep.subr.bf16.mxu1 %v3639_v33 }
  0x43   :  { %2571 = vmatpush1.bf16.msra.mxu0 %v3642_v37 }
  0x44   :  { %2603 = vmatpush1.bf16.msra.mxu1 %v3646_v41  ;;  %2573 = vmatprep.subr.bf16.mxu0 %v3648_v42 }
  0x45   :  { %2605 = vmatprep.subr.bf16.mxu1 %v3651_v46 }
  0x47   :  { %2575 = vmatpush1.bf16.msra.mxu0 %v3654_v53 }
  0x48   :  { %2607 = vmatpush1.bf16.msra.mxu1 %v3658_v54  ;;  %2577 = vmatprep.subr.bf16.mxu0 %v3660_v55 }
  0x49   :  { %2609 = vmatprep.subr.bf16.mxu1 %v3663_v59 }
  0x4b   :  { %2579 = vmatpush1.bf16.msra.mxu0 %v3666_v3 }
  0x4c   :  { %2611 = vmatpush1.bf16.msra.mxu1 %v3670_v4  ;;  %2581 = vmatprep.subr.bf16.mxu0 %v3672_v5 }
  0x4d   :  { %2613 = vmatprep.subr.bf16.mxu1 %v3675_v12 }
  0x4f   :  { %2583 = vmatpush1.bf16.msra.mxu0 %v3678_v21 }
  0x50   :  { %2615 = vmatpush1.bf16.msra.mxu1 %v3682_v23  ;;  %2585 = vmatprep.subr.bf16.mxu0 %v3684_v25 }
  0x51   :  { %2617 = vmatprep.subr.bf16.mxu1 %v3690_v31 }
  0x53   :  { %2587 = vmatpush1.bf16.msra.mxu0 %v3693_v39 }
  0x54   :  { %2619 = vmatpush1.bf16.msra.mxu1 %v3697_v40  ;;  %2589 = vmatprep.subr.bf16.mxu0 %v3699_v43 }
  0x55   :  { %2621 = vmatprep.subr.bf16.mxu1 %v3702_v47 }
  0x57   :  { %2591 = vmatpush1.bf16.msra.mxu0 %v3705_v50 }
  0x58   :  { %2623 = vmatpush1.bf16.msra.mxu1 %v3709_v51  ;;  %2625 = vmatprep.subr.bf16.mxu0 %v3615_v6 }
  0x59   :  { %2657 = vmatprep.subr.bf16.mxu1 %v3617_v10 }
  0xa9   :  { %v112_v0 = vpop.permute.xlu0 %111 }
  0xaa   :  { %v135_v13 = vmul.f32 %v3758_v63, %v112_v0  ;;  %v136_v14 = vmul.f32 %v3760_v7, %v112_v0  ;;  %v138_v35 = vmul.f32 %v3767_v16, %v112_v0  ;;  %v137_v57 = vmul.f32 %v3775_v44, %v112_v0 }
 0x10d   :  { %v205_v22 = vpop.f32.mrb[0].mxu0 }
 0x10e   :  { %v206_v27 = vadd.f32 %v205_v22, %v135_v13  ;;  %v276_v30 = vpop.f32.mrb[0].mxu1  ;;  %v207_v32 = vpop.f32.mrb[1].mxu0 }
 0x10f   :  { %v208_v34 = vadd.f32 %v207_v32, %v136_v14  ;;  %v278_v36 = vpop.f32.mrb[1].mxu1  ;;  %v277_v60 = vadd.f32 %v276_v30, %v137_v57  ;;  %v354_v57 = vpop.permute.xlu0 %353 }
 0x110   :  { %v302_v38 = vadd.f32 %v3769_v17, %v206_v27  ;;  %v279_v52 = vadd.f32 %v278_v36, %v138_v35 }
 0x111   :  { %v303_v45 = vadd.f32 %v3771_v26, %v208_v34  ;;  %v304_v61 = vadd.f32 %v3782_v62, %v277_v60  ;;  %v357_v60 = vmul.f32 %v354_v57, %v3760_v7 }
 0x112   :  { %v2458_v48 = vmul.f32 -1.442695, %v302_v38  ;;  %v305_v58 = vadd.f32 %v3778_v56, %v279_v52  ;;  %v3544_v52 = vmov 2  }
 0x113   :  { %v2459_v49 = vmul.f32 -1.442695, %v303_v45  ;;  %3290 = vset.pattern.permute.xlu1 %v3544_v52 }
 0x114   :  { %3298 = vpow2.f32 %v2458_v48  ;;  %v2460_v13 = vmul.f32 -1.442695, %v305_v58  ;;  %v356_v58 = vmul.f32 %v354_v57, %v3758_v63 }
 0x115   :  { %3300 = vpow2.f32 %v2459_v49  ;;  %v541_v49 = vld [vmem:[%s4381_s0] sm:$0x3] }
 0x116   :  { %3302 = vpow2.f32 %v2460_v13  ;;  %544 = vperm.xlu1 %3290, %v541_v49  }
 0x117   :  { %3304 = vtanh.f32 %v304_v61 }
 0x11e   :  { %v3299_v14 = vpop.eup %3298 }
 0x11f   :  { %v3301_v22 = vpop.eup %3300  ;;  %v309_v27 = vadd.f32 1.0, %v3299_v14 }
 0x120   :  { %v315_v32 = vadd.f32 1.0, %v3301_v22  ;;  %v3303_v8 = vpop.eup %3302 }
 0x121   :  { %3306 = vrcp.f32 %v309_v27  ;;  %v3305_v34 = vpop.eup %3304  ;;  %v322_v38 = vadd.f32 1.0, %v3303_v8  ;;  %v359_v8 = vmul.f32 %v354_v57, %v3767_v16 }
 0x122   :  { %3308 = vrcp.f32 %v315_v32 }
 0x123   :  { %3310 = vrcp.f32 %v322_v38 }
 0x12b   :  { %v3307_v0 = vpop.eup %3306 }
 0x12c   :  { %v3309_v35 = vpop.eup %3308  ;;  %v326_v36 = vmul.f32 %v3307_v0, %v3305_v34 }
 0x12d   :  { %v325_v30 = vmul.f32 0.0, %v3309_v35  ;;  %v3311_v18 = vpop.eup %3310 }
 0x12f   :  { %v3785_v9 = vadd.f32 %v326_v36, %v325_v30  ;;  %v358_v30 = vmul.f32 %v354_v57, %v3775_v44 }
 0x131   :  { %3312 = vtanh.f32 %v3785_v9 }
 0x13b   :  { %v3313_v45 = vpop.eup %3312 }
 0x13c   :  { %v3788_v48 = vmul.f32 %v3313_v45, %v3311_v18 }
 0x13e   :  { %4399 = vst [vmem:[#allocation9_spill] sm:$0xff] %v3788_v48  ;;  %425 = vmatmul.mubr.f32.vlgmr.msra.gmra.mrb[2].mxu0 %v3788_v48  ;;  %496 = vmatmul.mubr.f32.vlgmr.msra.gmra.mrb[2].mxu1 %v3788_v48 }
 0x13f   :  { %2627 = vmatpush1.bf16.msra.mxu0 %v3619_v11  ;;  %2659 = vmatpush1.bf16.msra.mxu1 %v3622_v15 }
 0x140   :  { %2629 = vmatprep.subr.bf16.mxu0 %v3626_v19  ;;  %2661 = vmatprep.subr.bf16.mxu1 %v3628_v20 }
 0x141   :  { %615 = vmatprep.mubr.f32.mxu0 %v4390_v1  ;;  %686 = vmatprep.mubr.f32.mxu1 %v4390_v1 }
 0x143   :  { %2631 = vmatpush1.bf16.msra.mxu0 %v3631_v24  ;;  %2663 = vmatpush1.bf16.msra.mxu1 %v3635_v28 }
 0x144   :  { %2633 = vmatprep.subr.bf16.mxu0 %v3637_v29  ;;  %2665 = vmatprep.subr.bf16.mxu1 %v3639_v33 }
 0x147   :  { %2635 = vmatpush1.bf16.msra.mxu0 %v3642_v37  ;;  %2667 = vmatpush1.bf16.msra.mxu1 %v3646_v41 }
 0x148   :  { %2637 = vmatprep.subr.bf16.mxu0 %v3648_v42  ;;  %2669 = vmatprep.subr.bf16.mxu1 %v3651_v46 }
 0x14b   :  { %2639 = vmatpush1.bf16.msra.mxu0 %v3654_v53  ;;  %2671 = vmatpush1.bf16.msra.mxu1 %v3658_v54 }
 0x14c   :  { %2641 = vmatprep.subr.bf16.mxu0 %v3660_v55  ;;  %2673 = vmatprep.subr.bf16.mxu1 %v3663_v59 }
 0x14f   :  { %2643 = vmatpush1.bf16.msra.mxu0 %v3666_v3  ;;  %2675 = vmatpush1.bf16.msra.mxu1 %v3670_v4 }
 0x150   :  { %2645 = vmatprep.subr.bf16.mxu0 %v3672_v5  ;;  %2677 = vmatprep.subr.bf16.mxu1 %v3675_v12 }
 0x153   :  { %2647 = vmatpush1.bf16.msra.mxu0 %v3678_v21  ;;  %2679 = vmatpush1.bf16.msra.mxu1 %v3682_v23 }
 0x154   :  { %2649 = vmatprep.subr.bf16.mxu0 %v3684_v25  ;;  %2681 = vmatprep.subr.bf16.mxu1 %v3690_v31 }
 0x157   :  { %2651 = vmatpush1.bf16.msra.mxu0 %v3693_v39  ;;  %2683 = vmatpush1.bf16.msra.mxu1 %v3697_v40 }
 0x158   :  { %2653 = vmatprep.subr.bf16.mxu0 %v3699_v43  ;;  %2685 = vmatprep.subr.bf16.mxu1 %v3702_v47 }
 0x15b   :  { %2655 = vmatpush1.bf16.msra.mxu0 %v3705_v50  ;;  %2687 = vmatpush1.bf16.msra.mxu1 %v3709_v51 }
 0x15c   :  { %2689 = vmatprep.subr.bf16.mxu0 %v3615_v6  ;;  %2721 = vmatprep.subr.bf16.mxu1 %v3617_v10 }
 0x211   :  { %v426_v13 = vpop.f32.mrb[2].mxu0  ;;  %v497_v61 = vpop.f32.mrb[2].mxu1 }
 0x212   :  { %v427_v14 = vadd.f32 %v426_v13, %v356_v58  ;;  %v428_v22 = vpop.f32.mrb[3].mxu0  ;;  %v499_v27 = vpop.f32.mrb[3].mxu1  ;;  %v498_v45 = vadd.f32 %v497_v61, %v358_v30  ;;  %v3545_v30 = vmov 3  }
 0x213   :  { %v429_v32 = vadd.f32 %v428_v22, %v357_v60  ;;  %v500_v38 = vadd.f32 %v499_v27, %v359_v8  ;;  %3291 = vset.pattern.permute.xlu1 %v3545_v30 }
 0x214   :  { %v502_v34 = vadd.f32 %v427_v14, %v3769_v17  ;;  %v504_v52 = vadd.f32 %v498_v45, %v3782_v62 }
 0x215   :  { %v503_v0 = vadd.f32 %v429_v32, %v3771_v26  ;;  %v505_v18 = vadd.f32 %v500_v38, %v3778_v56 }
 0x216   :  { %v2463_v35 = vmul.f32 -1.442695, %v502_v34 }
 0x217   :  { %v2464_v36 = vmul.f32 -1.442695, %v503_v0  ;;  %v2465_v49 = vmul.f32 -1.442695, %v505_v18  ;;  %v545_v18 = vpop.permute.xlu1 %544 }
 0x218   :  { %3314 = vpow2.f32 %v2463_v35  ;;  %v547_v45 = vmul.f32 %v545_v18, %v3758_v63 }
 0x219   :  { %3316 = vpow2.f32 %v2464_v36 }
 0x21a   :  { %3318 = vpow2.f32 %v2465_v49  ;;  %v548_v49 = vmul.f32 %v545_v18, %v3760_v7 }
 0x21b   :  { %3320 = vtanh.f32 %v504_v52 }
 0x222   :  { %v3315_v58 = vpop.eup %3314 }
 0x223   :  { %v3317_v60 = vpop.eup %3316  ;;  %v509_v13 = vadd.f32 1.0, %v3315_v58 }
 0x224   :  { %v515_v14 = vadd.f32 1.0, %v3317_v60  ;;  %v3319_v22 = vpop.eup %3318 }
 0x225   :  { %3322 = vrcp.f32 %v509_v13  ;;  %v3321_v27 = vpop.eup %3320  ;;  %v522_v34 = vadd.f32 1.0, %v3319_v22 }
 0x226   :  { %3324 = vrcp.f32 %v515_v14 }
 0x227   :  { %3326 = vrcp.f32 %v522_v34 }
 0x22f   :  { %v3323_v32 = vpop.eup %3322 }
 0x230   :  { %v3325_v8 = vpop.eup %3324  ;;  %v526_v57 = vmul.f32 %v3323_v32, %v3321_v27  ;;  %v550_v27 = vmul.f32 %v545_v18, %v3767_v16 }
 0x231   :  { %v525_v0 = vmul.f32 %v3325_v8, %v3785_v9  ;;  %v3327_v35 = vpop.eup %3326  ;;  %v732_v9 = vld [vmem:[%s4381_s0] sm:$0x3] }
 0x232   :  { %735 = vperm.xlu1 %3291, %v732_v9  }
 0x233   :  { %v3838_v61 = vadd.f32 %v526_v57, %v525_v0 }
 0x235   :  { %3328 = vtanh.f32 %v3838_v61 }
 0x23f   :  { %v3329_v36 = vpop.eup %3328 }
 0x240   :  { %v3841_v38 = vmul.f32 %v3329_v36, %v3327_v35  ;;  %v549_v35 = vmul.f32 %v545_v18, %v3775_v44 }
 0x242   :  { %616 = vmatmul.mubr.f32.vlgmr.msra.gmra.mrb[4].mxu0 %v3841_v38  ;;  %687 = vmatmul.mubr.f32.vlgmr.msra.gmra.mrb[4].mxu1 %v3841_v38 }
 0x243   :  { %2691 = vmatpush1.bf16.msra.mxu0 %v3619_v11  ;;  %2723 = vmatpush1.bf16.msra.mxu1 %v3622_v15 }
 0x244   :  { %2693 = vmatprep.subr.bf16.mxu0 %v3626_v19  ;;  %2725 = vmatprep.subr.bf16.mxu1 %v3628_v20 }
 0x245   :  { %806 = vmatprep.mubr.f32.mxu0 %v4390_v1  ;;  %877 = vmatprep.mubr.f32.mxu1 %v4390_v1 }
 0x247   :  { %2695 = vmatpush1.bf16.msra.mxu0 %v3631_v24  ;;  %2727 = vmatpush1.bf16.msra.mxu1 %v3635_v28 }
 0x248   :  { %2697 = vmatprep.subr.bf16.mxu0 %v3637_v29  ;;  %2729 = vmatprep.subr.bf16.mxu1 %v3639_v33 }
 0x24b   :  { %2699 = vmatpush1.bf16.msra.mxu0 %v3642_v37  ;;  %2731 = vmatpush1.bf16.msra.mxu1 %v3646_v41 }
 0x24c   :  { %2701 = vmatprep.subr.bf16.mxu0 %v3648_v42  ;;  %2733 = vmatprep.subr.bf16.mxu1 %v3651_v46 }
 0x24f   :  { %2703 = vmatpush1.bf16.msra.mxu0 %v3654_v53  ;;  %2735 = vmatpush1.bf16.msra.mxu1 %v3658_v54 }
 0x250   :  { %2705 = vmatprep.subr.bf16.mxu0 %v3660_v55  ;;  %2737 = vmatprep.subr.bf16.mxu1 %v3663_v59 }
 0x253   :  { %2707 = vmatpush1.bf16.msra.mxu0 %v3666_v3  ;;  %2739 = vmatpush1.bf16.msra.mxu1 %v3670_v4 }
 0x254   :  { %2709 = vmatprep.subr.bf16.mxu0 %v3672_v5  ;;  %2741 = vmatprep.subr.bf16.mxu1 %v3675_v12 }
 0x257   :  { %2711 = vmatpush1.bf16.msra.mxu0 %v3678_v21  ;;  %2743 = vmatpush1.bf16.msra.mxu1 %v3682_v23 }
 0x258   :  { %2713 = vmatprep.subr.bf16.mxu0 %v3684_v25  ;;  %2745 = vmatprep.subr.bf16.mxu1 %v3690_v31 }
 0x25b   :  { %2715 = vmatpush1.bf16.msra.mxu0 %v3693_v39  ;;  %2747 = vmatpush1.bf16.msra.mxu1 %v3697_v40 }
 0x25c   :  { %2717 = vmatprep.subr.bf16.mxu0 %v3699_v43  ;;  %2749 = vmatprep.subr.bf16.mxu1 %v3702_v47 }
 0x25f   :  { %2719 = vmatpush1.bf16.msra.mxu0 %v3705_v50  ;;  %2751 = vmatpush1.bf16.msra.mxu1 %v3709_v51 }
 0x260   :  { %2753 = vmatprep.subr.bf16.mxu0 %v3615_v6  ;;  %2785 = vmatprep.subr.bf16.mxu1 %v3617_v10 }
 0x315   :  { %v617_v52 = vpop.f32.mrb[4].mxu0  ;;  %v688_v58 = vpop.f32.mrb[4].mxu1 }
 0x316   :  { %v618_v60 = vadd.f32 %v617_v52, %v547_v45  ;;  %v619_v13 = vpop.f32.mrb[5].mxu0  ;;  %v690_v14 = vpop.f32.mrb[5].mxu1  ;;  %v689_v9 = vadd.f32 %v688_v58, %v549_v35 }
 0x317   :  { %v620_v22 = vadd.f32 %v619_v13, %v548_v49  ;;  %v691_v0 = vadd.f32 %v690_v14, %v550_v27 }
 0x318   :  { %v693_v32 = vadd.f32 %v618_v60, %v3769_v17  ;;  %v695_v45 = vadd.f32 %v689_v9, %v3782_v62  ;;  %v736_v9 = vpop.permute.xlu1 %735 }
 0x319   :  { %v694_v8 = vadd.f32 %v620_v22, %v3771_v26  ;;  %v696_v36 = vadd.f32 %v691_v0, %v3778_v56 }
 0x31a   :  { %v2466_v57 = vmul.f32 -1.442695, %v693_v32 }
 0x31b   :  { %v2467_v34 = vmul.f32 -1.442695, %v694_v8  ;;  %v2468_v30 = vmul.f32 -1.442695, %v696_v36  ;;  %v3546_v36 = vmov 4  }
 0x31c   :  { %3330 = vpow2.f32 %v2466_v57  ;;  %3292 = vset.pattern.permute.xlu1 %v3546_v36 }
 0x31d   :  { %3332 = vpow2.f32 %v2467_v34 }
 0x31e   :  { %3334 = vpow2.f32 %v2468_v30  ;;  %v738_v30 = vmul.f32 %v736_v9, %v3758_v63 }
 0x31f   :  { %3336 = vtanh.f32 %v695_v45  ;;  %v739_v45 = vmul.f32 %v736_v9, %v3760_v7 }
 0x326   :  { %v3331_v49 = vpop.eup %3330 }
 0x327   :  { %v3333_v52 = vpop.eup %3332  ;;  %v700_v13 = vadd.f32 1.0, %v3331_v49 }
 0x328   :  { %v706_v60 = vadd.f32 1.0, %v3333_v52  ;;  %v3335_v22 = vpop.eup %3334 }
 0x329   :  { %3338 = vrcp.f32 %v700_v13  ;;  %v3337_v14 = vpop.eup %3336  ;;  %v713_v8 = vadd.f32 1.0, %v3335_v22 }
 0x32a   :  { %3340 = vrcp.f32 %v706_v60 }
 0x32b   :  { %3342 = vrcp.f32 %v713_v8 }
 0x333   :  { %v3339_v27 = vpop.eup %3338 }
 0x334   :  { %v3341_v32 = vpop.eup %3340  ;;  %v717_v18 = vmul.f32 %v3339_v27, %v3337_v14  ;;  %v741_v27 = vmul.f32 %v736_v9, %v3767_v16 }
 0x335   :  { %v716_v57 = vmul.f32 %v3341_v32, %v3838_v61  ;;  %v3343_v34 = vpop.eup %3342  ;;  %v923_v61 = vld [vmem:[%s4381_s0] sm:$0x3] }
 0x336   :  { %926 = vperm.xlu1 %3292, %v923_v61  }
 0x337   :  { %v3891_v58 = vadd.f32 %v717_v18, %v716_v57 }
 0x339   :  { %3344 = vtanh.f32 %v3891_v58 }
 0x343   :  { %v3345_v0 = vpop.eup %3344 }
 0x344   :  { %v3894_v35 = vmul.f32 %v3345_v0, %v3343_v34  ;;  %v740_v0 = vmul.f32 %v736_v9, %v3775_v44 }
 0x346   :  { %4400 = vst [vmem:[#allocation10_spill] sm:$0xff] %v3894_v35  ;;  %807 = vmatmul.mubr.f32.vlgmr.msra.gmra.mrb[6].mxu0 %v3894_v35  ;;  %878 = vmatmul.mubr.f32.vlgmr.msra.gmra.mrb[6].mxu1 %v3894_v35 }
 0x347   :  { %2755 = vmatpush1.bf16.msra.mxu0 %v3619_v11  ;;  %2787 = vmatpush1.bf16.msra.mxu1 %v3622_v15 }
 0x348   :  { %2757 = vmatprep.subr.bf16.mxu0 %v3626_v19  ;;  %2789 = vmatprep.subr.bf16.mxu1 %v3628_v20 }
 0x349   :  { %997 = vmatprep.mubr.f32.mxu0 %v4390_v1  ;;  %1068 = vmatprep.mubr.f32.mxu1 %v4390_v1 }
 0x34b   :  { %2759 = vmatpush1.bf16.msra.mxu0 %v3631_v24  ;;  %2791 = vmatpush1.bf16.msra.mxu1 %v3635_v28 }
 0x34c   :  { %2761 = vmatprep.subr.bf16.mxu0 %v3637_v29  ;;  %2793 = vmatprep.subr.bf16.mxu1 %v3639_v33 }
 0x34f   :  { %2763 = vmatpush1.bf16.msra.mxu0 %v3642_v37  ;;  %2795 = vmatpush1.bf16.msra.mxu1 %v3646_v41 }
 0x350   :  { %2765 = vmatprep.subr.bf16.mxu0 %v3648_v42  ;;  %2797 = vmatprep.subr.bf16.mxu1 %v3651_v46 }
 0x353   :  { %2767 = vmatpush1.bf16.msra.mxu0 %v3654_v53  ;;  %2799 = vmatpush1.bf16.msra.mxu1 %v3658_v54 }
 0x354   :  { %2769 = vmatprep.subr.bf16.mxu0 %v3660_v55  ;;  %2801 = vmatprep.subr.bf16.mxu1 %v3663_v59 }
 0x357   :  { %2771 = vmatpush1.bf16.msra.mxu0 %v3666_v3  ;;  %2803 = vmatpush1.bf16.msra.mxu1 %v3670_v4 }
 0x358   :  { %2773 = vmatprep.subr.bf16.mxu0 %v3672_v5  ;;  %2805 = vmatprep.subr.bf16.mxu1 %v3675_v12 }
 0x35b   :  { %2775 = vmatpush1.bf16.msra.mxu0 %v3678_v21  ;;  %2807 = vmatpush1.bf16.msra.mxu1 %v3682_v23 }
 0x35c   :  { %2777 = vmatprep.subr.bf16.mxu0 %v3684_v25  ;;  %2809 = vmatprep.subr.bf16.mxu1 %v3690_v31 }
 0x35f   :  { %2779 = vmatpush1.bf16.msra.mxu0 %v3693_v39  ;;  %2811 = vmatpush1.bf16.msra.mxu1 %v3697_v40 }
 0x360   :  { %2781 = vmatprep.subr.bf16.mxu0 %v3699_v43  ;;  %2813 = vmatprep.subr.bf16.mxu1 %v3702_v47 }
 0x363   :  { %2783 = vmatpush1.bf16.msra.mxu0 %v3705_v50  ;;  %2815 = vmatpush1.bf16.msra.mxu1 %v3709_v51 }
 0x364   :  { %2817 = vmatprep.subr.bf16.mxu0 %v3615_v6  ;;  %2849 = vmatprep.subr.bf16.mxu1 %v3617_v10 }
 0x419   :  { %v808_v49 = vpop.f32.mrb[6].mxu0  ;;  %v879_v52 = vpop.f32.mrb[6].mxu1 }
 0x41a   :  { %v809_v13 = vadd.f32 %v808_v49, %v738_v30  ;;  %v810_v60 = vpop.f32.mrb[7].mxu0  ;;  %v881_v22 = vpop.f32.mrb[7].mxu1  ;;  %v880_v36 = vadd.f32 %v879_v52, %v740_v0 }
 0x41b   :  { %v811_v14 = vadd.f32 %v810_v60, %v739_v45  ;;  %v882_v34 = vadd.f32 %v881_v22, %v741_v27 }
 0x41c   :  { %v884_v32 = vadd.f32 %v809_v13, %v3769_v17  ;;  %v886_v49 = vadd.f32 %v880_v36, %v3782_v62  ;;  %v927_v36 = vpop.permute.xlu1 %926 }
 0x41d   :  { %v885_v18 = vadd.f32 %v811_v14, %v3771_v26  ;;  %v887_v61 = vadd.f32 %v882_v34, %v3778_v56 }
 0x41e   :  { %v2469_v8 = vmul.f32 -1.442695, %v884_v32 }
 0x41f   :  { %v2470_v57 = vmul.f32 -1.442695, %v885_v18  ;;  %v2471_v30 = vmul.f32 -1.442695, %v887_v61  ;;  %v4402_v61 = vmov 0  }
 0x420   :  { %3346 = vpow2.f32 %v2469_v8 }
 0x421   :  { %3348 = vpow2.f32 %v2470_v57 }
 0x422   :  { %3350 = vpow2.f32 %v2471_v30  ;;  %v929_v30 = vmul.f32 %v927_v36, %v3758_v63 }
 0x423   :  { %3352 = vtanh.f32 %v886_v49  ;;  %v930_v49 = vmul.f32 %v927_v36, %v3760_v7 }
 0x42a   :  { %v3347_v45 = vpop.eup %3346 }
 0x42b   :  { %v3349_v60 = vpop.eup %3348  ;;  %v891_v2 = vadd.f32 1.0, %v3347_v45 }
 0x42c   :  { %v897_v13 = vadd.f32 1.0, %v3349_v60  ;;  %v3351_v14 = vpop.eup %3350 }
 0x42d   :  { %3354 = vrcp.f32 %v891_v2  ;;  %v3353_v22 = vpop.eup %3352  ;;  %v904_v18 = vadd.f32 1.0, %v3351_v14  ;;  %v1114_v2 = vld [vmem:[%s4381_s0] sm:$0x3] }
 0x42e   :  { %3356 = vrcp.f32 %v897_v13 }
 0x42f   :  { %3358 = vrcp.f32 %v904_v18 }
 0x437   :  { %v3355_v27 = vpop.eup %3354 }
 0x438   :  { %v3357_v32 = vpop.eup %3356  ;;  %v908_v9 = vmul.f32 %v3355_v27, %v3353_v22 }
 0x439   :  { %v907_v8 = vmul.f32 %v3357_v32, %v3891_v58  ;;  %v3359_v57 = vpop.eup %3358  ;;  %v3547_v58 = vmov 5   ;;  %v932_v32 = vmul.f32 %v927_v36, %v3767_v16 }
 0x43a   :  { %3293 = vset.pattern.permute.xlu0 %v3547_v58 }
 0x43b   :  { %v3944_v52 = vadd.f32 %v908_v9, %v907_v8  ;;  %1117 = vperm.xlu0 %3293, %v1114_v2   ;;  %v931_v2 = vmul.f32 %v927_v36, %v3775_v44 }
 0x43d   :  { %3360 = vtanh.f32 %v3944_v52 }
 0x43f   :  { %3297 = vset.pattern.permute.xlu0 %v4402_v61 }
 0x447   :  { %v3361_v34 = vpop.eup %3360 }
 0x448   :  { %v3947_v0 = vmul.f32 %v3361_v34, %v3359_v57 }
 0x44a   :  { %4401 = vst [vmem:[#allocation11_spill] sm:$0xff] %v3947_v0  ;;  %998 = vmatmul.mubr.f32.vlgmr.msra.gmra.mrb[8].mxu0 %v3947_v0  ;;  %1069 = vmatmul.mubr.f32.vlgmr.msra.gmra.mrb[8].mxu1 %v3947_v0 }
 0x44b   :  { %2819 = vmatpush1.bf16.msra.mxu0 %v3619_v11  ;;  %2851 = vmatpush1.bf16.msra.mxu1 %v3622_v15 }
 0x44c   :  { %2821 = vmatprep.subr.bf16.mxu0 %v3626_v19  ;;  %2853 = vmatprep.subr.bf16.mxu1 %v3628_v20 }
 0x44d   :  { %1188 = vmatprep.mubr.f32.mxu0 %v4390_v1  ;;  %1259 = vmatprep.mubr.f32.mxu1 %v4390_v1 }
 0x44f   :  { %2823 = vmatpush1.bf16.msra.mxu0 %v3631_v24  ;;  %2855 = vmatpush1.bf16.msra.mxu1 %v3635_v28 }
 0x450   :  { %2825 = vmatprep.subr.bf16.mxu0 %v3637_v29  ;;  %2857 = vmatprep.subr.bf16.mxu1 %v3639_v33 }
 0x453   :  { %2827 = vmatpush1.bf16.msra.mxu0 %v3642_v37  ;;  %2859 = vmatpush1.bf16.msra.mxu1 %v3646_v41 }
 0x454   :  { %2829 = vmatprep.subr.bf16.mxu0 %v3648_v42  ;;  %2861 = vmatprep.subr.bf16.mxu1 %v3651_v46 }
 0x457   :  { %2831 = vmatpush1.bf16.msra.mxu0 %v3654_v53  ;;  %2863 = vmatpush1.bf16.msra.mxu1 %v3658_v54 }
 0x458   :  { %2833 = vmatprep.subr.bf16.mxu0 %v3660_v55  ;;  %2865 = vmatprep.subr.bf16.mxu1 %v3663_v59 }
 0x45b   :  { %2835 = vmatpush1.bf16.msra.mxu0 %v3666_v3  ;;  %2867 = vmatpush1.bf16.msra.mxu1 %v3670_v4 }
 0x45c   :  { %2837 = vmatprep.subr.bf16.mxu0 %v3672_v5  ;;  %2869 = vmatprep.subr.bf16.mxu1 %v3675_v12 }
 0x45f   :  { %2839 = vmatpush1.bf16.msra.mxu0 %v3678_v21  ;;  %2871 = vmatpush1.bf16.msra.mxu1 %v3682_v23 }
 0x460   :  { %2841 = vmatprep.subr.bf16.mxu0 %v3684_v25  ;;  %2873 = vmatprep.subr.bf16.mxu1 %v3690_v31 }
 0x463   :  { %2843 = vmatpush1.bf16.msra.mxu0 %v3693_v39  ;;  %2875 = vmatpush1.bf16.msra.mxu1 %v3697_v40 }
 0x464   :  { %2845 = vmatprep.subr.bf16.mxu0 %v3699_v43  ;;  %2877 = vmatprep.subr.bf16.mxu1 %v3702_v47 }
 0x467   :  { %2847 = vmatpush1.bf16.msra.mxu0 %v3705_v50  ;;  %2879 = vmatpush1.bf16.msra.mxu1 %v3709_v51 }
 0x468   :  { %2881 = vmatprep.subr.bf16.mxu0 %v3615_v6  ;;  %2913 = vmatprep.subr.bf16.mxu1 %v3617_v10 }
 0x51d   :  { %v999_v45 = vpop.f32.mrb[8].mxu0  ;;  %v1070_v60 = vpop.f32.mrb[8].mxu1 }
 0x51e   :  { %v1000_v13 = vadd.f32 %v999_v45, %v929_v30  ;;  %v1001_v14 = vpop.f32.mrb[9].mxu0  ;;  %v1072_v22 = vpop.f32.mrb[9].mxu1  ;;  %v1071_v1 = vadd.f32 %v1070_v60, %v931_v2  ;;  %v3548_v2 = vmov 6  }
 0x51f   :  { %v1002_v27 = vadd.f32 %v1001_v14, %v930_v49  ;;  %v1073_v34 = vadd.f32 %v1072_v22, %v932_v32  ;;  %3294 = vset.pattern.permute.xlu1 %v3548_v2 }
 0x520   :  { %v1075_v9 = vadd.f32 %v1000_v13, %v3769_v17  ;;  %v1077_v45 = vadd.f32 %v1071_v1, %v3782_v62 }
 0x521   :  { %v1076_v18 = vadd.f32 %v1002_v27, %v3771_v26  ;;  %v1078_v58 = vadd.f32 %v1073_v34, %v3778_v56 }
 0x522   :  { %v2472_v8 = vmul.f32 -1.442695, %v1075_v9 }
 0x523   :  { %v2473_v57 = vmul.f32 -1.442695, %v1076_v18  ;;  %v2474_v30 = vmul.f32 -1.442695, %v1078_v58  ;;  %v1118_v58 = vpop.permute.xlu0 %1117 }
 0x524   :  { %3362 = vpow2.f32 %v2472_v8 }
 0x525   :  { %3364 = vpow2.f32 %v2473_v57 }
 0x526   :  { %3366 = vpow2.f32 %v2474_v30  ;;  %v1120_v30 = vmul.f32 %v1118_v58, %v3758_v63 }
 0x527   :  { %3368 = vtanh.f32 %v1077_v45  ;;  %v1121_v45 = vmul.f32 %v1118_v58, %v3760_v7 }
 0x52e   :  { %v3363_v49 = vpop.eup %3362 }
 0x52f   :  { %v3365_v14 = vpop.eup %3364  ;;  %v1082_v0 = vadd.f32 1.0, %v3363_v49 }
 0x530   :  { %v1088_v13 = vadd.f32 1.0, %v3365_v14  ;;  %v3367_v27 = vpop.eup %3366 }
 0x531   :  { %3370 = vrcp.f32 %v1082_v0  ;;  %v3369_v22 = vpop.eup %3368  ;;  %v1095_v18 = vadd.f32 1.0, %v3367_v27  ;;  %v1305_v0 = vld [vmem:[%s4381_s0] sm:$0x3] }
 0x532   :  { %3372 = vrcp.f32 %v1088_v13  ;;  %1308 = vperm.xlu1 %3294, %v1305_v0   ;;  %v1122_v0 = vmul.f32 %v1118_v58, %v3775_v44 }
 0x533   :  { %3374 = vrcp.f32 %v1095_v18 }
 0x53b   :  { %v3371_v32 = vpop.eup %3370 }
 0x53c   :  { %v3373_v9 = vpop.eup %3372  ;;  %v1099_v36 = vmul.f32 %v3371_v32, %v3369_v22 }
 0x53d   :  { %v1098_v8 = vmul.f32 %v3373_v9, %v3944_v52  ;;  %v3375_v1 = vpop.eup %3374  ;;  %v4404_v52 = vmov 0.0   ;;  %v1123_v9 = vmul.f32 %v1118_v58, %v3767_v16 }
 0x53f   :  { %v3998_v60 = vadd.f32 %v1099_v36, %v1098_v8 }
 0x541   :  { %3376 = vtanh.f32 %v3998_v60 }
 0x54b   :  { %v3377_v57 = vpop.eup %3376 }
 0x54c   :  { %v4001_v34 = vmul.f32 %v3377_v57, %v3375_v1 }
 0x54e   :  { %4403 = vst [vmem:[#allocation12_spill] sm:$0xff] %v4001_v34  ;;  %1189 = vmatmul.mubr.f32.vlgmr.msra.gmra.mrb[10].mxu0 %v4001_v34  ;;  %1260 = vmatmul.mubr.f32.vlgmr.msra.gmra.mrb[10].mxu1 %v4001_v34 }
 0x54f   :  { %2883 = vmatpush1.bf16.msra.mxu0 %v3619_v11  ;;  %2915 = vmatpush1.bf16.msra.mxu1 %v3622_v15 }
 0x550   :  { %2885 = vmatprep.subr.bf16.mxu0 %v3626_v19  ;;  %2917 = vmatprep.subr.bf16.mxu1 %v3628_v20 }
 0x551   :  { %1379 = vmatprep.mubr.f32.mxu0 %v4404_v52  ;;  %1450 = vmatprep.mubr.f32.mxu1 %v4404_v52 }
 0x553   :  { %2887 = vmatpush1.bf16.msra.mxu0 %v3631_v24  ;;  %2919 = vmatpush1.bf16.msra.mxu1 %v3635_v28 }
 0x554   :  { %2889 = vmatprep.subr.bf16.mxu0 %v3637_v29  ;;  %2921 = vmatprep.subr.bf16.mxu1 %v3639_v33 }
 0x557   :  { %2891 = vmatpush1.bf16.msra.mxu0 %v3642_v37  ;;  %2923 = vmatpush1.bf16.msra.mxu1 %v3646_v41 }
 0x558   :  { %2893 = vmatprep.subr.bf16.mxu0 %v3648_v42  ;;  %2925 = vmatprep.subr.bf16.mxu1 %v3651_v46 }
 0x55b   :  { %2895 = vmatpush1.bf16.msra.mxu0 %v3654_v53  ;;  %2927 = vmatpush1.bf16.msra.mxu1 %v3658_v54 }
 0x55c   :  { %2897 = vmatprep.subr.bf16.mxu0 %v3660_v55  ;;  %2929 = vmatprep.subr.bf16.mxu1 %v3663_v59 }
 0x55f   :  { %2899 = vmatpush1.bf16.msra.mxu0 %v3666_v3  ;;  %2931 = vmatpush1.bf16.msra.mxu1 %v3670_v4 }
 0x560   :  { %2901 = vmatprep.subr.bf16.mxu0 %v3672_v5  ;;  %2933 = vmatprep.subr.bf16.mxu1 %v3675_v12 }
 0x563   :  { %2903 = vmatpush1.bf16.msra.mxu0 %v3678_v21  ;;  %2935 = vmatpush1.bf16.msra.mxu1 %v3682_v23 }
 0x564   :  { %2905 = vmatprep.subr.bf16.mxu0 %v3684_v25  ;;  %2937 = vmatprep.subr.bf16.mxu1 %v3690_v31 }
 0x567   :  { %2907 = vmatpush1.bf16.msra.mxu0 %v3693_v39  ;;  %2939 = vmatpush1.bf16.msra.mxu1 %v3697_v40 }
 0x568   :  { %2909 = vmatprep.subr.bf16.mxu0 %v3699_v43  ;;  %2941 = vmatprep.subr.bf16.mxu1 %v3702_v47 }
 0x56b   :  { %2911 = vmatpush1.bf16.msra.mxu0 %v3705_v50  ;;  %2943 = vmatpush1.bf16.msra.mxu1 %v3709_v51 }
 0x56c   :  { %2945 = vmatprep.subr.bf16.mxu0 %v3615_v6  ;;  %2977 = vmatprep.subr.bf16.mxu1 %v3617_v10 }
 0x621   :  { %v1190_v49 = vpop.f32.mrb[10].mxu0  ;;  %v1261_v14 = vpop.f32.mrb[10].mxu1 }
 0x622   :  { %v1191_v13 = vadd.f32 %v1190_v49, %v1120_v30  ;;  %v1192_v27 = vpop.f32.mrb[11].mxu0  ;;  %v1263_v22 = vpop.f32.mrb[11].mxu1  ;;  %v1262_v34 = vadd.f32 %v1261_v14, %v1122_v0 }
 0x623   :  { %v1193_v32 = vadd.f32 %v1192_v27, %v1121_v45  ;;  %v1264_v57 = vadd.f32 %v1263_v22, %v1123_v9  ;;  %v1309_v0 = vpop.permute.xlu1 %1308 }
 0x624   :  { %v1266_v36 = vadd.f32 %v1191_v13, %v3769_v17  ;;  %v1268_v49 = vadd.f32 %v1262_v34, %v3782_v62 }
 0x625   :  { %v1267_v18 = vadd.f32 %v1193_v32, %v3771_v26  ;;  %v1269_v2 = vadd.f32 %v1264_v57, %v3778_v56 }
 0x626   :  { %v2475_v8 = vmul.f32 -1.442695, %v1266_v36 }
 0x627   :  { %v2476_v1 = vmul.f32 -1.442695, %v1267_v18  ;;  %v2477_v30 = vmul.f32 -1.442695, %v1269_v2  ;;  %v1311_v2 = vmul.f32 %v1309_v0, %v3758_v63 }
 0x628   :  { %3378 = vpow2.f32 %v2475_v8 }
 0x629   :  { %3380 = vpow2.f32 %v2476_v1 }
 0x62a   :  { %3382 = vpow2.f32 %v2477_v30  ;;  %v1312_v30 = vmul.f32 %v1309_v0, %v3760_v7 }
 0x62b   :  { %3384 = vtanh.f32 %v1268_v49 }
 0x632   :  { %v3379_v45 = vpop.eup %3378 }
 0x633   :  { %v3381_v27 = vpop.eup %3380  ;;  %v1273_v35 = vadd.f32 1.0, %v3379_v45 }
 0x634   :  { %v1279_v13 = vadd.f32 1.0, %v3381_v27  ;;  %v3383_v32 = vpop.eup %3382 }
 0x635   :  { %3386 = vrcp.f32 %v1273_v35  ;;  %v3385_v22 = vpop.eup %3384  ;;  %v1286_v18 = vadd.f32 1.0, %v3383_v32  ;;  %v1496_v35 = vld [vmem:[%s4381_s0] sm:$0x3] }
 0x636   :  { %3388 = vrcp.f32 %v1279_v13 }
 0x637   :  { %3390 = vrcp.f32 %v1286_v18 }
 0x63f   :  { %v3387_v9 = vpop.eup %3386 }
 0x640   :  { %v3389_v36 = vpop.eup %3388  ;;  %v1290_v58 = vmul.f32 %v3387_v9, %v3385_v22  ;;  %v1314_v9 = vmul.f32 %v1309_v0, %v3767_v16 }
 0x641   :  { %v1289_v8 = vmul.f32 %v3389_v36, %v3998_v60  ;;  %v3391_v34 = vpop.eup %3390  ;;  %v3549_v60 = vmov 7  }
 0x642   :  { %3295 = vset.pattern.permute.xlu1 %v3549_v60 }
 0x643   :  { %v4051_v14 = vadd.f32 %v1290_v58, %v1289_v8  ;;  %1499 = vperm.xlu1 %3295, %v1496_v35  }
 0x645   :  { %3392 = vtanh.f32 %v4051_v14 }
 0x647   :  { %3296 = vset.pattern.permute.xlu1 %v4402_v61 }
 0x64f   :  { %v3393_v1 = vpop.eup %3392 }
 0x650   :  { %v4054_v57 = vmul.f32 %v3393_v1, %v3391_v34  ;;  %v1313_v34 = vmul.f32 %v1309_v0, %v3775_v44 }
 0x652   :  { %4405 = vst [vmem:[#allocation13_spill] sm:$0xff] %v4054_v57  ;;  %1380 = vmatmul.mubr.f32.vlgmr.msra.gmra.mrb[12].mxu0 %v4054_v57  ;;  %1451 = vmatmul.mubr.f32.vlgmr.msra.gmra.mrb[12].mxu1 %v4054_v57 }
 0x653   :  { %2947 = vmatpush1.bf16.msra.mxu0 %v3619_v11  ;;  %2979 = vmatpush1.bf16.msra.mxu1 %v3622_v15 }
 0x654   :  { %2949 = vmatprep.subr.bf16.mxu0 %v3626_v19  ;;  %2981 = vmatprep.subr.bf16.mxu1 %v3628_v20 }
 0x655   :  { %1570 = vmatprep.mubr.f32.mxu0 %v4404_v52  ;;  %1641 = vmatprep.mubr.f32.mxu1 %v4404_v52 }
 0x657   :  { %2951 = vmatpush1.bf16.msra.mxu0 %v3631_v24  ;;  %2983 = vmatpush1.bf16.msra.mxu1 %v3635_v28 }
 0x658   :  { %2953 = vmatprep.subr.bf16.mxu0 %v3637_v29  ;;  %2985 = vmatprep.subr.bf16.mxu1 %v3639_v33 }
 0x65b   :  { %2955 = vmatpush1.bf16.msra.mxu0 %v3642_v37  ;;  %2987 = vmatpush1.bf16.msra.mxu1 %v3646_v41 }
 0x65c   :  { %2957 = vmatprep.subr.bf16.mxu0 %v3648_v42  ;;  %2989 = vmatprep.subr.bf16.mxu1 %v3651_v46 }
 0x65f   :  { %2959 = vmatpush1.bf16.msra.mxu0 %v3654_v53  ;;  %2991 = vmatpush1.bf16.msra.mxu1 %v3658_v54 }
 0x660   :  { %2961 = vmatprep.subr.bf16.mxu0 %v3660_v55  ;;  %2993 = vmatprep.subr.bf16.mxu1 %v3663_v59 }
 0x663   :  { %2963 = vmatpush1.bf16.msra.mxu0 %v3666_v3  ;;  %2995 = vmatpush1.bf16.msra.mxu1 %v3670_v4 }
 0x664   :  { %2965 = vmatprep.subr.bf16.mxu0 %v3672_v5  ;;  %2997 = vmatprep.subr.bf16.mxu1 %v3675_v12 }
 0x667   :  { %2967 = vmatpush1.bf16.msra.mxu0 %v3678_v21  ;;  %2999 = vmatpush1.bf16.msra.mxu1 %v3682_v23 }
 0x668   :  { %2969 = vmatprep.subr.bf16.mxu0 %v3684_v25  ;;  %3001 = vmatprep.subr.bf16.mxu1 %v3690_v31 }
 0x66b   :  { %2971 = vmatpush1.bf16.msra.mxu0 %v3693_v39  ;;  %3003 = vmatpush1.bf16.msra.mxu1 %v3697_v40 }
 0x66c   :  { %2973 = vmatprep.subr.bf16.mxu0 %v3699_v43  ;;  %3005 = vmatprep.subr.bf16.mxu1 %v3702_v47 }
 0x66f   :  { %2975 = vmatpush1.bf16.msra.mxu0 %v3705_v50  ;;  %3007 = vmatpush1.bf16.msra.mxu1 %v3709_v51 }
 0x670   :  { %3009 = vmatprep.subr.bf16.mxu0 %v3615_v6  ;;  %3041 = vmatprep.subr.bf16.mxu1 %v3617_v10 }
 0x725   :  { %v1381_v49 = vpop.f32.mrb[12].mxu0  ;;  %v1452_v45 = vpop.f32.mrb[12].mxu1 }
 0x726   :  { %v1382_v27 = vadd.f32 %v1381_v49, %v1311_v2  ;;  %v1383_v13 = vpop.f32.mrb[13].mxu0  ;;  %v1454_v32 = vpop.f32.mrb[13].mxu1  ;;  %v1453_v35 = vadd.f32 %v1452_v45, %v1313_v34 }
 0x727   :  { %v1384_v22 = vadd.f32 %v1383_v13, %v1312_v30  ;;  %v1455_v61 = vadd.f32 %v1454_v32, %v1314_v9 }
 0x728   :  { %v1457_v36 = vadd.f32 %v1382_v27, %v3769_v17  ;;  %v1459_v2 = vadd.f32 %v1453_v35, %v3782_v62 }
 0x729   :  { %v1458_v58 = vadd.f32 %v1384_v22, %v3771_v26  ;;  %v1460_v1 = vadd.f32 %v1455_v61, %v3778_v56 }
 0x72a   :  { %v2478_v18 = vmul.f32 -1.442695, %v1457_v36 }
 0x72b   :  { %v2479_v8 = vmul.f32 -1.442695, %v1458_v58  ;;  %v2480_v60 = vmul.f32 -1.442695, %v1460_v1 }
 0x72c   :  { %3394 = vpow2.f32 %v2478_v18 }
 0x72d   :  { %3396 = vpow2.f32 %v2479_v8 }
 0x72e   :  { %3398 = vpow2.f32 %v2480_v60 }
 0x72f   :  { %3400 = vtanh.f32 %v1459_v2 }
 0x736   :  { %v3395_v30 = vpop.eup %3394 }
 0x737   :  { %v3397_v49 = vpop.eup %3396  ;;  %v1464_v13 = vadd.f32 1.0, %v3395_v30 }
 0x738   :  { %v1470_v27 = vadd.f32 1.0, %v3397_v49  ;;  %v3399_v22 = vpop.eup %3398 }
 0x739   :  { %3402 = vrcp.f32 %v1464_v13  ;;  %v3401_v32 = vpop.eup %3400  ;;  %v1477_v58 = vadd.f32 1.0, %v3399_v22 }
 0x73a   :  { %3404 = vrcp.f32 %v1470_v27 }
 0x73b   :  { %3406 = vrcp.f32 %v1477_v58 }
 0x743   :  { %v3403_v9 = vpop.eup %3402 }
 0x744   :  { %v3405_v36 = vpop.eup %3404  ;;  %v1481_v0 = vmul.f32 %v3403_v9, %v3401_v32 }
 0x745   :  { %v1480_v18 = vmul.f32 %v3405_v36, %v4051_v14  ;;  %v3407_v8 = vpop.eup %3406  ;;  %v1500_v14 = vpop.permute.xlu1 %1499 }
 0x746   :  { %v1502_v1 = vmul.f32 %v1500_v14, %v3758_v63  ;;  %v1503_v35 = vmul.f32 %v1500_v14, %v3760_v7  ;;  %v1505_v22 = vmul.f32 %v1500_v14, %v3767_v16 }
 0x747   :  { %v4105_v45 = vadd.f32 %v1481_v0, %v1480_v18  ;;  %v1504_v18 = vmul.f32 %v1500_v14, %v3775_v44 }
 0x749   :  { %3408 = vtanh.f32 %v4105_v45 }
 0x753   :  { %v3409_v61 = vpop.eup %3408 }
 0x754   :  { %v4108_v34 = vmul.f32 %v3409_v61, %v3407_v8 }
 0x756   :  { %4406 = vst [vmem:[#allocation14_spill] sm:$0xff] %v4108_v34  ;;  %1571 = vmatmul.mubr.f32.vlgmr.msra.gmra.mrb[14].mxu0 %v4108_v34  ;;  %1642 = vmatmul.mubr.f32.vlgmr.msra.gmra.mrb[14].mxu1 %v4108_v34 }
 0x757   :  { %3011 = vmatpush1.bf16.msra.mxu0 %v3619_v11  ;;  %3043 = vmatpush1.bf16.msra.mxu1 %v3622_v15 }
 0x758   :  { %3013 = vmatprep.subr.bf16.mxu0 %v3626_v19  ;;  %3045 = vmatprep.subr.bf16.mxu1 %v3628_v20 }
 0x759   :  { %1759 = vmatprep.mubr.f32.mxu0 %v4404_v52  ;;  %1830 = vmatprep.mubr.f32.mxu1 %v4404_v52 }
 0x75b   :  { %3015 = vmatpush1.bf16.msra.mxu0 %v3631_v24  ;;  %3047 = vmatpush1.bf16.msra.mxu1 %v3635_v28 }
 0x75c   :  { %3017 = vmatprep.subr.bf16.mxu0 %v3637_v29  ;;  %3049 = vmatprep.subr.bf16.mxu1 %v3639_v33 }
 0x75f   :  { %3019 = vmatpush1.bf16.msra.mxu0 %v3642_v37  ;;  %3051 = vmatpush1.bf16.msra.mxu1 %v3646_v41 }
 0x760   :  { %3021 = vmatprep.subr.bf16.mxu0 %v3648_v42  ;;  %3053 = vmatprep.subr.bf16.mxu1 %v3651_v46 }
 0x763   :  { %3023 = vmatpush1.bf16.msra.mxu0 %v3654_v53  ;;  %3055 = vmatpush1.bf16.msra.mxu1 %v3658_v54 }
 0x764   :  { %3025 = vmatprep.subr.bf16.mxu0 %v3660_v55  ;;  %3057 = vmatprep.subr.bf16.mxu1 %v3663_v59 }
 0x767   :  { %3027 = vmatpush1.bf16.msra.mxu0 %v3666_v3  ;;  %3059 = vmatpush1.bf16.msra.mxu1 %v3670_v4 }
 0x768   :  { %3029 = vmatprep.subr.bf16.mxu0 %v3672_v5  ;;  %3061 = vmatprep.subr.bf16.mxu1 %v3675_v12 }
 0x76b   :  { %3031 = vmatpush1.bf16.msra.mxu0 %v3678_v21  ;;  %3063 = vmatpush1.bf16.msra.mxu1 %v3682_v23 }
 0x76c   :  { %3033 = vmatprep.subr.bf16.mxu0 %v3684_v25  ;;  %3065 = vmatprep.subr.bf16.mxu1 %v3690_v31 }
 0x76f   :  { %3035 = vmatpush1.bf16.msra.mxu0 %v3693_v39  ;;  %3067 = vmatpush1.bf16.msra.mxu1 %v3697_v40 }
 0x770   :  { %3037 = vmatprep.subr.bf16.mxu0 %v3699_v43  ;;  %3069 = vmatprep.subr.bf16.mxu1 %v3702_v47 }
 0x773   :  { %3039 = vmatpush1.bf16.msra.mxu0 %v3705_v50  ;;  %3071 = vmatpush1.bf16.msra.mxu1 %v3709_v51 }
 0x774   :  { %3073 = vmatprep.subr.bf16.mxu0 %v3615_v6  ;;  %3105 = vmatprep.subr.bf16.mxu1 %v3617_v10 }
 0x829   :  { %v1572_v60 = vpop.f32.mrb[14].mxu0  ;;  %v1643_v2 = vpop.f32.mrb[14].mxu1 }
 0x82a   :  { %v1573_v30 = vadd.f32 %v1572_v60, %v1502_v1  ;;  %v1574_v49 = vpop.f32.mrb[15].mxu0  ;;  %v1645_v13 = vpop.f32.mrb[15].mxu1  ;;  %v1644_v61 = vadd.f32 %v1643_v2, %v1504_v18 }
 0x82b   :  { %v1575_v27 = vadd.f32 %v1574_v49, %v1503_v35  ;;  %v1646_v58 = vadd.f32 %v1645_v13, %v1505_v22 }
 0x82c   :  { %v1648_v32 = vadd.f32 %v1573_v30, %v3769_v17  ;;  %v1650_v60 = vadd.f32 %v1644_v61, %v3782_v62  ;;  %v4199_v61 = vld [vmem:[#allocation2] ss:$0 sm:$0xff] }
 0x82d   :  { %v1649_v9 = vadd.f32 %v1575_v27, %v3771_v26  ;;  %v1651_v8 = vadd.f32 %v1646_v58, %v3778_v56 }
 0x82e   :  { %v2481_v36 = vmul.f32 -1.442695, %v1648_v32 }
 0x82f   :  { %v2482_v0 = vmul.f32 -1.442695, %v1649_v9  ;;  %v2483_v1 = vmul.f32 -1.442695, %v1651_v8 }
 0x830   :  { %3410 = vpow2.f32 %v2481_v36 }
 0x831   :  { %3412 = vpow2.f32 %v2482_v0 }
 0x832   :  { %3414 = vpow2.f32 %v2483_v1 }
 0x833   :  { %3416 = vtanh.f32 %v1650_v60 }
 0x83a   :  { %v3411_v35 = vpop.eup %3410 }
 0x83b   :  { %v3413_v49 = vpop.eup %3412  ;;  %v1655_v34 = vadd.f32 1.0, %v3411_v35 }
 0x83c   :  { %v1661_v30 = vadd.f32 1.0, %v3413_v49  ;;  %v3415_v27 = vpop.eup %3414 }
 0x83d   :  { %3418 = vrcp.f32 %v1655_v34  ;;  %v3417_v13 = vpop.eup %3416  ;;  %v1668_v9 = vadd.f32 1.0, %v3415_v27  ;;  %v4161_v34 = vld [vmem:[%s4385_s4] ss:$0 sm:$0xff]  ;;  %s3550_s4 = smov 1  }
 0x83e   :  { %3420 = vrcp.f32 %v1661_v30 }
 0x83f   :  { %3422 = vrcp.f32 %v1668_v9 }
 0x847   :  { %v3419_v22 = vpop.eup %3418 }
 0x848   :  { %v3421_v32 = vpop.eup %3420  ;;  %v1672_v14 = vmul.f32 %v3419_v22, %v3417_v13 }
 0x849   :  { %v1671_v36 = vmul.f32 %v3421_v32, %v4105_v45  ;;  %v3423_v0 = vpop.eup %3422 }
 0x84b   :  { %v4155_v2 = vadd.f32 %v1672_v14, %v1671_v36 }
 0x84d   :  { %3424 = vtanh.f32 %v4155_v2 }
 0x857   :  { %v3425_v58 = vpop.eup %3424 }
 0x858   :  { %v1675_v18 = vmul.f32 %v3425_v58, %v3423_v0 }
 0x85a   :  { %1760 = vmatmul.mubr.f32.vlgmr.msra.gmra.mrb[16].mxu0 %v1675_v18  ;;  %1831 = vmatmul.mubr.f32.vlgmr.msra.gmra.mrb[16].mxu1 %v1675_v18  ;;  %v1676_v8 = vmul.f32 %v4161_v34, %v1675_v18 }
 0x85b   :  { %3075 = vmatpush1.bf16.msra.mxu0 %v3619_v11  ;;  %3107 = vmatpush1.bf16.msra.mxu1 %v3622_v15 }
 0x85c   :  { %v1677_v45 = vsel %vm337_vm0, %v1676_v8, 0.0  ;;  %3077 = vmatprep.subr.bf16.mxu0 %v3626_v19  ;;  %3109 = vmatprep.subr.bf16.mxu1 %v3628_v20 }
 0x85d   :  { %1678 = vadd.xlane.f32.xlu0 %v1677_v45  ;;  %1948 = vmatprep.mubr.f32.mxu0 %v4404_v52 }
 0x85e   :  { %2019 = vmatprep.mubr.f32.mxu1 %v4404_v52 }
 0x85f   :  { %3079 = vmatpush1.bf16.msra.mxu0 %v3631_v24  ;;  %3111 = vmatpush1.bf16.msra.mxu1 %v3635_v28 }
 0x860   :  { %3081 = vmatprep.subr.bf16.mxu0 %v3637_v29  ;;  %3113 = vmatprep.subr.bf16.mxu1 %v3639_v33 }
 0x863   :  { %3083 = vmatpush1.bf16.msra.mxu0 %v3642_v37  ;;  %3115 = vmatpush1.bf16.msra.mxu1 %v3646_v41 }
 0x864   :  { %3085 = vmatprep.subr.bf16.mxu0 %v3648_v42  ;;  %3117 = vmatprep.subr.bf16.mxu1 %v3651_v46 }
 0x867   :  { %3087 = vmatpush1.bf16.msra.mxu0 %v3654_v53  ;;  %3119 = vmatpush1.bf16.msra.mxu1 %v3658_v54 }
 0x868   :  { %3089 = vmatprep.subr.bf16.mxu0 %v3660_v55  ;;  %3121 = vmatprep.subr.bf16.mxu1 %v3663_v59 }
 0x86b   :  { %3091 = vmatpush1.bf16.msra.mxu0 %v3666_v3  ;;  %3123 = vmatpush1.bf16.msra.mxu1 %v3670_v4 }
 0x86c   :  { %3093 = vmatprep.subr.bf16.mxu0 %v3672_v5  ;;  %3125 = vmatprep.subr.bf16.mxu1 %v3675_v12 }
 0x86f   :  { %3095 = vmatpush1.bf16.msra.mxu0 %v3678_v21  ;;  %3127 = vmatpush1.bf16.msra.mxu1 %v3682_v23 }
 0x870   :  { %3097 = vmatprep.subr.bf16.mxu0 %v3684_v25  ;;  %3129 = vmatprep.subr.bf16.mxu1 %v3690_v31 }
 0x873   :  { %3099 = vmatpush1.bf16.msra.mxu0 %v3693_v39  ;;  %3131 = vmatpush1.bf16.msra.mxu1 %v3697_v40 }
 0x874   :  { %3101 = vmatprep.subr.bf16.mxu0 %v3699_v43  ;;  %3133 = vmatprep.subr.bf16.mxu1 %v3702_v47 }
 0x877   :  { %3103 = vmatpush1.bf16.msra.mxu0 %v3705_v50  ;;  %3135 = vmatpush1.bf16.msra.mxu1 %v3709_v51 }
 0x878   :  { %3137 = vmatprep.subr.bf16.mxu0 %v3615_v6  ;;  %3169 = vmatprep.subr.bf16.mxu1 %v3617_v10 }
 0x8ea   :  { %v1679_v1 = vpop.xlane.xlu0 %1678 }
 0x8eb   :  { %v4202_v60 = vadd.f32 %v4199_v61, %v1679_v1 }
 0x8ed   :  { %4407 = vst [vmem:[#allocation15_spill] sm:$0xff] %v4202_v60  ;;  %1688 = vperm.xlu1 %3296, %v4202_v60  }
 0x92d   :  { %v1761_v35 = vpop.f32.mrb[16].mxu0  ;;  %v1832_v49 = vpop.f32.mrb[16].mxu1 }
 0x92e   :  { %v1763_v30 = vpop.f32.mrb[17].mxu0  ;;  %v1834_v27 = vpop.f32.mrb[17].mxu1 }
 0x96c   :  { %v1689_v13 = vpop.permute.xlu1 %1688 }
 0x96d   :  { %v1691_v22 = vmul.f32 %v1689_v13, %v3758_v63  ;;  %v1692_v32 = vmul.f32 %v1689_v13, %v3760_v7  ;;  %v1694_v36 = vmul.f32 %v1689_v13, %v3767_v16  ;;  %v1693_v1 = vmul.f32 %v1689_v13, %v3775_v44 }
 0x96f   :  { %v1762_v14 = vadd.f32 %v1761_v35, %v1691_v22  ;;  %v1764_v9 = vadd.f32 %v1763_v30, %v1692_v32  ;;  %v1835_v45 = vadd.f32 %v1834_v27, %v1694_v36  ;;  %v1833_v57 = vadd.f32 %v1832_v49, %v1693_v1 }
 0x971   :  { %v1837_v0 = vadd.f32 %v1762_v14, %v3769_v17  ;;  %v1838_v58 = vadd.f32 %v1764_v9, %v3771_v26  ;;  %v1840_v60 = vadd.f32 %v1835_v45, %v3778_v56  ;;  %v1839_v35 = vadd.f32 %v1833_v57, %v3782_v62 }
 0x973   :  { %v2484_v18 = vmul.f32 -1.442695, %v1837_v0  ;;  %v2485_v8 = vmul.f32 -1.442695, %v1838_v58  ;;  %v2486_v48 = vmul.f32 -1.442695, %v1840_v60 }
 0x975   :  { %3426 = vpow2.f32 %v2484_v18 }
 0x976   :  { %3428 = vpow2.f32 %v2485_v8 }
 0x977   :  { %3430 = vpow2.f32 %v2486_v48 }
 0x978   :  { %3432 = vtanh.f32 %v1839_v35 }
 0x97f   :  { %v3427_v30 = vpop.eup %3426 }
 0x980   :  { %v3429_v22 = vpop.eup %3428  ;;  %v1844_v32 = vadd.f32 1.0, %v3427_v30 }
 0x981   :  { %v1850_v14 = vadd.f32 1.0, %v3429_v22  ;;  %v3431_v9 = vpop.eup %3430 }
 0x982   :  { %3434 = vrcp.f32 %v1844_v32  ;;  %v3433_v27 = vpop.eup %3432  ;;  %v1857_v0 = vadd.f32 1.0, %v3431_v9 }
 0x983   :  { %3436 = vrcp.f32 %v1850_v14 }
 0x984   :  { %3438 = vrcp.f32 %v1857_v0 }
 0x98c   :  { %v3435_v36 = vpop.eup %3434 }
 0x98d   :  { %v3437_v13 = vpop.eup %3436  ;;  %v1861_v58 = vmul.f32 %v3435_v36, %v3433_v27 }
 0x98e   :  { %v1860_v18 = vmul.f32 %v3437_v13, %v4155_v2  ;;  %v3439_v57 = vpop.eup %3438 }
 0x990   :  { %v4214_v49 = vadd.f32 %v1861_v58, %v1860_v18 }
 0x992   :  { %3440 = vtanh.f32 %v4214_v49 }
 0x99c   :  { %v3441_v60 = vpop.eup %3440 }
 0x99d   :  { %v1864_v48 = vmul.f32 %v3441_v60, %v3439_v57 }
 0x99f   :  { %1949 = vmatmul.mubr.f32.vlgmr.msra.gmra.mrb[18].mxu0 %v1864_v48  ;;  %2020 = vmatmul.mubr.f32.vlgmr.msra.gmra.mrb[18].mxu1 %v1864_v48  ;;  %v1865_v8 = vmul.f32 %v4161_v34, %v1864_v48 }
 0x9a0   :  { %3139 = vmatpush1.bf16.msra.mxu0 %v3619_v11  ;;  %3171 = vmatpush1.bf16.msra.mxu1 %v3622_v15 }
 0x9a1   :  { %v1866_v45 = vsel %vm337_vm0, %v1865_v8, 0.0  ;;  %3141 = vmatprep.subr.bf16.mxu0 %v3626_v19  ;;  %3173 = vmatprep.subr.bf16.mxu1 %v3628_v20 }
 0x9a2   :  { %1867 = vadd.xlane.f32.xlu1 %v1866_v45  ;;  %2137 = vmatprep.mubr.f32.mxu0 %v4404_v52 }
 0x9a3   :  { %2208 = vmatprep.mubr.f32.mxu1 %v4404_v52 }
 0x9a4   :  { %3143 = vmatpush1.bf16.msra.mxu0 %v3631_v24  ;;  %3175 = vmatpush1.bf16.msra.mxu1 %v3635_v28 }
 0x9a5   :  { %3145 = vmatprep.subr.bf16.mxu0 %v3637_v29  ;;  %3177 = vmatprep.subr.bf16.mxu1 %v3639_v33 }
 0x9a8   :  { %3147 = vmatpush1.bf16.msra.mxu0 %v3642_v37  ;;  %3179 = vmatpush1.bf16.msra.mxu1 %v3646_v41 }
 0x9a9   :  { %3149 = vmatprep.subr.bf16.mxu0 %v3648_v42  ;;  %3181 = vmatprep.subr.bf16.mxu1 %v3651_v46 }
 0x9ac   :  { %3151 = vmatpush1.bf16.msra.mxu0 %v3654_v53  ;;  %3183 = vmatpush1.bf16.msra.mxu1 %v3658_v54 }
 0x9ad   :  { %3153 = vmatprep.subr.bf16.mxu0 %v3660_v55  ;;  %3185 = vmatprep.subr.bf16.mxu1 %v3663_v59 }
 0x9b0   :  { %3155 = vmatpush1.bf16.msra.mxu0 %v3666_v3  ;;  %3187 = vmatpush1.bf16.msra.mxu1 %v3670_v4 }
 0x9b1   :  { %3157 = vmatprep.subr.bf16.mxu0 %v3672_v5  ;;  %3189 = vmatprep.subr.bf16.mxu1 %v3675_v12 }
 0x9b4   :  { %3159 = vmatpush1.bf16.msra.mxu0 %v3678_v21  ;;  %3191 = vmatpush1.bf16.msra.mxu1 %v3682_v23 }
 0x9b5   :  { %3161 = vmatprep.subr.bf16.mxu0 %v3684_v25  ;;  %3193 = vmatprep.subr.bf16.mxu1 %v3690_v31 }
 0x9b8   :  { %3163 = vmatpush1.bf16.msra.mxu0 %v3693_v39  ;;  %3195 = vmatpush1.bf16.msra.mxu1 %v3697_v40 }
 0x9b9   :  { %3165 = vmatprep.subr.bf16.mxu0 %v3699_v43  ;;  %3197 = vmatprep.subr.bf16.mxu1 %v3702_v47 }
 0x9bc   :  { %3167 = vmatpush1.bf16.msra.mxu0 %v3705_v50  ;;  %3199 = vmatpush1.bf16.msra.mxu1 %v3709_v51 }
 0x9bd   :  { %3201 = vmatprep.subr.bf16.mxu0 %v3615_v6  ;;  %3233 = vmatprep.subr.bf16.mxu1 %v3617_v10 }
 0xa2f   :  { %v1868_v2 = vpop.xlane.xlu1 %1867 }
 0xa30   :  { %v4254_v1 = vadd.f32 %v4199_v61, %v1868_v2 }
 0xa32   :  { %1877 = vperm.xlu0 %3297, %v4254_v1  }
 0xa72   :  { %v1950_v35 = vpop.f32.mrb[18].mxu0  ;;  %v2021_v30 = vpop.f32.mrb[18].mxu1 }
 0xa73   :  { %v1952_v22 = vpop.f32.mrb[19].mxu0  ;;  %v2023_v32 = vpop.f32.mrb[19].mxu1 }
 0xab1   :  { %v1878_v14 = vpop.permute.xlu0 %1877 }
 0xab2   :  { %v1880_v9 = vmul.f32 %v1878_v14, %v3758_v63  ;;  %v1881_v27 = vmul.f32 %v1878_v14, %v3760_v7  ;;  %v1883_v6 = vmul.f32 %v1878_v14, %v3767_v16  ;;  %v1882_v60 = vmul.f32 %v1878_v14, %v3775_v44 }
 0xab4   :  { %v1951_v36 = vadd.f32 %v1950_v35, %v1880_v9  ;;  %v1953_v13 = vadd.f32 %v1952_v22, %v1881_v27  ;;  %v2024_v57 = vadd.f32 %v2023_v32, %v1883_v6  ;;  %v2022_v8 = vadd.f32 %v2021_v30, %v1882_v60 }
 0xab6   :  { %v2026_v10 = vadd.f32 %v1951_v36, %v3769_v17  ;;  %v2027_v0 = vadd.f32 %v1953_v13, %v3771_v26  ;;  %v2029_v48 = vadd.f32 %v2024_v57, %v3778_v56  ;;  %v2028_v2 = vadd.f32 %v2022_v8, %v3782_v62 }
 0xab8   :  { %v2487_v58 = vmul.f32 -1.442695, %v2026_v10  ;;  %v2488_v18 = vmul.f32 -1.442695, %v2027_v0  ;;  %v2489_v45 = vmul.f32 -1.442695, %v2029_v48 }
 0xaba   :  { %3442 = vpow2.f32 %v2487_v58 }
 0xabb   :  { %3444 = vpow2.f32 %v2488_v18 }
 0xabc   :  { %3446 = vpow2.f32 %v2489_v45 }
 0xabd   :  { %3448 = vtanh.f32 %v2028_v2 }
 0xac4   :  { %v3443_v35 = vpop.eup %3442 }
 0xac5   :  { %v3445_v22 = vpop.eup %3444  ;;  %v2033_v9 = vadd.f32 1.0, %v3443_v35 }
 0xac6   :  { %v2039_v27 = vadd.f32 1.0, %v3445_v22  ;;  %v3447_v36 = vpop.eup %3446 }
 0xac7   :  { %3450 = vrcp.f32 %v2033_v9  ;;  %v3449_v32 = vpop.eup %3448  ;;  %v2046_v6 = vadd.f32 1.0, %v3447_v36  ;;  %v530_v36 = vmul.f32 %v4161_v34, %v3841_v38 }
 0xac8   :  { %3452 = vrcp.f32 %v2039_v27 }
 0xac9   :  { %3454 = vrcp.f32 %v2046_v6 }
 0xad1   :  { %v3451_v13 = vpop.eup %3450 }
 0xad2   :  { %v3453_v14 = vpop.eup %3452  ;;  %v2050_v10 = vmul.f32 %v3451_v13, %v3449_v32  ;;  %v531_v32 = vsel %vm337_vm0, %v530_v36, 0.0 }
 0xad3   :  { %v2049_v0 = vmul.f32 %v3453_v14, %v4214_v49  ;;  %v3455_v58 = vpop.eup %3454 }
 0xad5   :  { %v4266_v30 = vadd.f32 %v2050_v10, %v2049_v0  ;;  %v4408_v0 = vld [vmem:[#allocation9_spill] sm:$0xff] }
 0xad7   :  { %3456 = vtanh.f32 %v4266_v30 }
 0xae1   :  { %v3457_v18 = vpop.eup %3456 }
 0xae2   :  { %v2053_v57 = vmul.f32 %v3457_v18, %v3455_v58  ;;  %v4409_v58 = vld [vmem:[#allocation10_spill] sm:$0xff] }
 0xae3   :  { %v721_v18 = vmul.f32 %v4161_v34, %v4409_v58 }
 0xae4   :  { %2138 = vmatmul.mubr.f32.vlgmr.msra.gmra.mrb[20].mxu0 %v2053_v57  ;;  %2209 = vmatmul.mubr.f32.vlgmr.msra.gmra.mrb[20].mxu1 %v2053_v57  ;;  %v2054_v60 = vmul.f32 %v4161_v34, %v2053_v57 }
 0xae5   :  { %3203 = vmatpush1.bf16.msra.mxu0 %v3619_v11  ;;  %3235 = vmatpush1.bf16.msra.mxu1 %v3622_v15  ;;  %v722_v57 = vsel %vm337_vm0, %v721_v18, 0.0  ;;  %v4413_v18 = vld [vmem:[#allocation12_spill] sm:$0xff] }
 0xae6   :  { %v2055_v48 = vsel %vm337_vm0, %v2054_v60, 0.0  ;;  %3205 = vmatprep.subr.bf16.mxu0 %v3626_v19  ;;  %3237 = vmatprep.subr.bf16.mxu1 %v3628_v20  ;;  %v4410_v60 = vld [vmem:[#allocation11_spill] sm:$0xff] }
 0xae7   :  { %2056 = vadd.xlane.f32.xlu1 %v2055_v48  ;;  %2326 = vmatprep.mubr.f32.mxu0 %v4404_v52  ;;  %v912_v48 = vmul.f32 %v4161_v34, %v4410_v60 }
 0xae8   :  { %2397 = vmatprep.mubr.f32.mxu1 %v4404_v52 }
 0xae9   :  { %3207 = vmatpush1.bf16.msra.mxu0 %v3631_v24  ;;  %3239 = vmatpush1.bf16.msra.mxu1 %v3635_v28 }
 0xaea   :  { %3209 = vmatprep.subr.bf16.mxu0 %v3637_v29  ;;  %3241 = vmatprep.subr.bf16.mxu1 %v3639_v33 }
 0xaed   :  { %3211 = vmatpush1.bf16.msra.mxu0 %v3642_v37  ;;  %3243 = vmatpush1.bf16.msra.mxu1 %v3646_v41 }
 0xaee   :  { %3213 = vmatprep.subr.bf16.mxu0 %v3648_v42  ;;  %3245 = vmatprep.subr.bf16.mxu1 %v3651_v46 }
 0xaf1   :  { %3215 = vmatpush1.bf16.msra.mxu0 %v3654_v53  ;;  %3247 = vmatpush1.bf16.msra.mxu1 %v3658_v54 }
 0xaf2   :  { %3217 = vmatprep.subr.bf16.mxu0 %v3660_v55  ;;  %3249 = vmatprep.subr.bf16.mxu1 %v3663_v59 }
 0xaf5   :  { %3219 = vmatpush1.bf16.msra.mxu0 %v3666_v3  ;;  %3251 = vmatpush1.bf16.msra.mxu1 %v3670_v4 }
 0xaf6   :  { %3221 = vmatprep.subr.bf16.mxu0 %v3672_v5  ;;  %3253 = vmatprep.subr.bf16.mxu1 %v3675_v12 }
 0xaf9   :  { %3223 = vmatpush1.bf16.msra.mxu0 %v3678_v21  ;;  %3255 = vmatpush1.bf16.msra.mxu1 %v3682_v23 }
 0xafa   :  { %3225 = vmatprep.subr.bf16.mxu0 %v3684_v25  ;;  %3257 = vmatprep.subr.bf16.mxu1 %v3690_v31 }
 0xafd   :  { %3227 = vmatpush1.bf16.msra.mxu0 %v3693_v39  ;;  %3259 = vmatpush1.bf16.msra.mxu1 %v3697_v40 }
 0xafe   :  { %3229 = vmatprep.subr.bf16.mxu0 %v3699_v43  ;;  %3261 = vmatprep.subr.bf16.mxu1 %v3702_v47 }
 0xb01   :  { %3231 = vmatpush1.bf16.msra.mxu0 %v3705_v50  ;;  %3263 = vmatpush1.bf16.msra.mxu1 %v3709_v51 }
 0xb74   :  { %v2057_v11 = vpop.xlane.xlu1 %2056 }
 0xb75   :  { %v4304_v15 = vadd.f32 %v4199_v61, %v2057_v11  ;;  %v913_v11 = vsel %vm337_vm0, %v912_v48, 0.0 }
 0xb77   :  { %2066 = vperm.xlu1 %3296, %v4304_v15  }
 0xbb7   :  { %v2139_v19 = vpop.f32.mrb[20].mxu0  ;;  %v2210_v20 = vpop.f32.mrb[20].mxu1 }
 0xbb8   :  { %v2141_v24 = vpop.f32.mrb[21].mxu0  ;;  %v2212_v28 = vpop.f32.mrb[21].mxu1 }
 0xbf6   :  { %v2067_v29 = vpop.permute.xlu1 %2066 }
 0xbf7   :  { %v2069_v33 = vmul.f32 %v2067_v29, %v3758_v63  ;;  %v2070_v37 = vmul.f32 %v2067_v29, %v3760_v7  ;;  %v2072_v46 = vmul.f32 %v2067_v29, %v3767_v16  ;;  %v2071_v4 = vmul.f32 %v2067_v29, %v3775_v44 }
 0xbf9   :  { %v2140_v41 = vadd.f32 %v2139_v19, %v2069_v33  ;;  %v2142_v42 = vadd.f32 %v2141_v24, %v2070_v37  ;;  %v2213_v3 = vadd.f32 %v2212_v28, %v2072_v46  ;;  %v2211_v12 = vadd.f32 %v2210_v20, %v2071_v4  ;;  %v4411_v19 = vld [vmem:[#allocation13_spill] sm:$0xff]  ;;  %v4412_v28 = vld [vmem:[#allocation14_spill] sm:$0xff] }
 0xbfa   :  { %v1294_v20 = vmul.f32 %v4161_v34, %v4411_v19  ;;  %v1485_v29 = vmul.f32 %v4161_v34, %v4412_v28 }
 0xbfb   :  { %v2215_v53 = vadd.f32 %v2140_v41, %v3769_v17  ;;  %v2216_v54 = vadd.f32 %v2142_v42, %v3771_v26  ;;  %v2218_v5 = vadd.f32 %v2213_v3, %v3778_v56  ;;  %v2217_v23 = vadd.f32 %v2211_v12, %v3782_v62 }
 0xbfc   :  { %v1295_v24 = vsel %vm337_vm0, %v1294_v20, 0.0  ;;  %v1486_v33 = vsel %vm337_vm0, %v1485_v29, 0.0 }
 0xbfd   :  { %v2490_v55 = vmul.f32 -1.442695, %v2215_v53  ;;  %v2491_v59 = vmul.f32 -1.442695, %v2216_v54  ;;  %v2492_v21 = vmul.f32 -1.442695, %v2218_v5 }
 0xbff   :  { %3458 = vpow2.f32 %v2490_v55 }
 0xc00   :  { %3460 = vpow2.f32 %v2491_v59 }
 0xc01   :  { %3462 = vpow2.f32 %v2492_v21 }
 0xc02   :  { %3464 = vtanh.f32 %v2217_v23 }
 0xc09   :  { %v3459_v25 = vpop.eup %3458 }
 0xc0a   :  { %v3461_v31 = vpop.eup %3460  ;;  %v2222_v39 = vadd.f32 1.0, %v3459_v25 }
 0xc0b   :  { %v2228_v40 = vadd.f32 1.0, %v3461_v31  ;;  %v3463_v43 = vpop.eup %3462 }
 0xc0c   :  { %3466 = vrcp.f32 %v2222_v39  ;;  %v3465_v47 = vpop.eup %3464  ;;  %v2235_v52 = vadd.f32 1.0, %v3463_v43 }
 0xc0d   :  { %3468 = vrcp.f32 %v2228_v40 }
 0xc0e   :  { %3470 = vrcp.f32 %v2235_v52 }
 0xc16   :  { %v3467_v50 = vpop.eup %3466 }
 0xc17   :  { %v3469_v51 = vpop.eup %3468  ;;  %v2239_v49 = vmul.f32 %v3467_v50, %v3465_v47 }
 0xc18   :  { %v2238_v8 = vmul.f32 %v3469_v51, %v4266_v30  ;;  %v3471_v2 = vpop.eup %3470  ;;  %v336_v30 = vmul.f32 %v4161_v34, %v4408_v0 }
 0xc1a   :  { %v4316_v45 = vadd.f32 %v2239_v49, %v2238_v8  ;;  %v338_v38 = vsel %vm337_vm0, %v336_v30, 0.0 }
 0xc1c   :  { %3472 = vtanh.f32 %v4316_v45 }
 0xc26   :  { %v3473_v35 = vpop.eup %3472 }
 0xc27   :  { %v2242_v22 = vmul.f32 %v3473_v35, %v3471_v2 }
 0xc29   :  { %2327 = vmatmul.mubr.f32.vlgmr.msra.gmra.mrb[22].mxu0 %v2242_v22  ;;  %2398 = vmatmul.mubr.f32.vlgmr.msra.gmra.mrb[22].mxu1 %v2242_v22  ;;  %v2243_v9 = vmul.f32 %v4161_v34, %v2242_v22 }
 0xc2b   :  { %v2244_v27 = vsel %vm337_vm0, %v2243_v9, 0.0 }
 0xc2c   :  { %2245 = vadd.xlane.f32.xlu1 %v2244_v27 }
 0xc30   :  { %532 = vadd.xlane.f32.xlu1 %v531_v32 }
 0xcb9   :  { %v2246_v13 = vpop.xlane.xlu1 %2245 }
 0xcba   :  { %v4325_v14 = vadd.f32 %v4199_v61, %v2246_v13 }
 0xcbc   :  { %2255 = vperm.xlu0 %3297, %v4325_v14  }
 0xcbd   :  { %v533_v6 = vpop.xlane.xlu1 %532 }
 0xcbe   :  { %v534_v10 = vadd.f32 %v4199_v61, %v533_v6 }
 0xcc0   :  { %536 = vrot.lane.b32.xlu1 %v534_v10, %s3550_s4 }
 0xcdb   :  { %339 = vadd.xlane.f32.xlu0 %v338_v38 }
 0xcdf   :  { %723 = vadd.xlane.f32.xlu0 %v722_v57  ;;  %v1103_v57 = vmul.f32 %v4161_v34, %v4413_v18 }
 0xce1   :  { %v1104_v60 = vsel %vm337_vm0, %v1103_v57, 0.0 }
 0xce4   :  { %914 = vadd.xlane.f32.xlu1 %v913_v11 }
 0xce8   :  { %1296 = vadd.xlane.f32.xlu1 %v1295_v24  ;;  %v4414_v24 = vld [vmem:[#allocation15_spill] sm:$0xff] }
 0xcec   :  { %1487 = vadd.xlane.f32.xlu1 %v1486_v33 }
 0xcfc   :  { %v2328_v37 = vpop.f32.mrb[22].mxu0  ;;  %v2399_v41 = vpop.f32.mrb[22].mxu1 }
 0xcfd   :  { %v2330_v42 = vpop.f32.mrb[23].mxu0  ;;  %v2401_v46 = vpop.f32.mrb[23].mxu1 }
 0xd32   :  { %v537_v9 = vpop.permute.xlu1 %536 }
 0xd3b   :  { %v2256_v53 = vpop.permute.xlu0 %2255 }
 0xd3c   :  { %v2258_v54 = vmul.f32 %v2256_v53, %v3758_v63  ;;  %v2259_v55 = vmul.f32 %v2256_v53, %v3760_v7  ;;  %v2261_v4 = vmul.f32 %v2256_v53, %v3767_v16  ;;  %v2260_v31 = vmul.f32 %v2256_v53, %v3775_v44 }
 0xd3e   :  { %v2329_v59 = vadd.f32 %v2328_v37, %v2258_v54  ;;  %v2331_v3 = vadd.f32 %v2330_v42, %v2259_v55  ;;  %v2402_v25 = vadd.f32 %v2401_v46, %v2261_v4  ;;  %v2400_v63 = vadd.f32 %v2399_v41, %v2260_v31 }
 0xd40   :  { %v2404_v5 = vadd.f32 %v2329_v59, %v3769_v17  ;;  %v2405_v12 = vadd.f32 %v2331_v3, %v3771_v26  ;;  %v2407_v39 = vadd.f32 %v2402_v25, %v3778_v56  ;;  %v2406_v7 = vadd.f32 %v2400_v63, %v3782_v62 }
 0xd42   :  { %v2493_v21 = vmul.f32 -1.442695, %v2404_v5  ;;  %v2494_v23 = vmul.f32 -1.442695, %v2405_v12  ;;  %v2495_v40 = vmul.f32 -1.442695, %v2407_v39 }
 0xd44   :  { %3474 = vpow2.f32 %v2493_v21 }
 0xd45   :  { %3476 = vpow2.f32 %v2494_v23 }
 0xd46   :  { %3478 = vpow2.f32 %v2495_v40 }
 0xd47   :  { %3480 = vtanh.f32 %v2406_v7 }
 0xd4e   :  { %v3475_v43 = vpop.eup %3474 }
 0xd4f   :  { %v3477_v47 = vpop.eup %3476  ;;  %v2411_v16 = vadd.f32 1.0, %v3475_v43 }
 0xd50   :  { %v2417_v17 = vadd.f32 1.0, %v3477_v47  ;;  %v3479_v26 = vpop.eup %3478 }
 0xd51   :  { %3482 = vrcp.f32 %v2411_v16  ;;  %v3481_v50 = vpop.eup %3480  ;;  %v2424_v52 = vadd.f32 1.0, %v3479_v26 }
 0xd52   :  { %3484 = vrcp.f32 %v2417_v17 }
 0xd53   :  { %3486 = vrcp.f32 %v2424_v52 }
 0xd5b   :  { %v3483_v51 = vpop.eup %3482 }
 0xd5c   :  { %v3485_v44 = vpop.eup %3484  ;;  %v2428_v49 = vmul.f32 %v3483_v51, %v3481_v50 }
 0xd5d   :  { %v2427_v56 = vmul.f32 %v3485_v44, %v4316_v45  ;;  %v3487_v35 = vpop.eup %3486 }
 0xd5f   :  { %v2429_v8 = vadd.f32 %v2428_v49, %v2427_v56 }
 0xd61   :  { %3488 = vtanh.f32 %v2429_v8 }
 0xd68   :  { %v340_v62 = vpop.xlane.xlu0 %339 }
 0xd69   :  { %v347_v2 = vadd.f32 %v4199_v61, %v340_v62 }
 0xd6b   :  { %v3489_v22 = vpop.eup %3488  ;;  %349 = vst.msk [vmem:[#allocation6] sm:$0x3] %vm348_vm1, %v347_v2 }
 0xd6c   :  { %v724_v27 = vpop.xlane.xlu0 %723  ;;  %v2431_v36 = vmul.f32 %v3489_v22, %v3487_v35  ;;  %540 = vst.msk [vmem:[#allocation6] sm:$0x3] %vm539_vm2, %v537_v9 }
 0xd6d   :  { %v725_v32 = vadd.f32 %v4199_v61, %v724_v27 }
 0xd6e   :  { %v2432_v13 = vmul.f32 %v4161_v34, %v2431_v36 }
 0xd6f   :  { %727 = vrot.lane.b32.xlu0 %v725_v32, %s3551_s30 }
 0xd70   :  { %v2433_v45 = vsel %vm337_vm0, %v2432_v13, 0.0 }
 0xd71   :  { %2434 = vadd.xlane.f32.xlu1 %v2433_v45  ;;  %v915_v6 = vpop.xlane.xlu1 %914 }
 0xd72   :  { %v916_v0 = vadd.f32 %v4199_v61, %v915_v6 }
 0xd75   :  { %v1297_v10 = vpop.xlane.xlu1 %1296 }
 0xd76   :  { %v1298_v30 = vadd.f32 %v4199_v61, %v1297_v10 }
 0xd79   :  { %v1488_v38 = vpop.xlane.xlu1 %1487 }
 0xd7a   :  { %v1489_v58 = vadd.f32 %v4199_v61, %v1488_v38 }
 0xd82   :  { %918 = vrot.lane.b32.xlu1 %v916_v0, %s3552_s7 }
 0xd86   :  { %1300 = vrot.lane.b32.xlu1 %v1298_v30, %s3553_s5 }
 0xd8a   :  { %1491 = vrot.lane.b32.xlu1 %v1489_v58, %s3554_s8 }
 0xd8e   :  { %1871 = vrot.lane.b32.xlu1 %v4254_v1, %s3555_s9  ;;  %1105 = vadd.xlane.f32.xlu0 %v1104_v60 }
 0xd92   :  { %2249 = vrot.lane.b32.xlu1 %v4325_v14, %s3556_s10 }
 0xde1   :  { %v728_v48 = vpop.permute.xlu0 %727 }
 0xde2   :  { %731 = vst.msk [vmem:[#allocation6] sm:$0x3] %vm730_vm3, %v728_v48 }
 0xdfe   :  { %v2435_v11 = vpop.xlane.xlu1 %2434 }
 0xdff   :  { %v2436_v1 = vadd.f32 %v4199_v61, %v2435_v11 }
 0xe02   :  { %v919_v19 = vpop.permute.xlu1 %918 }
 0xe03   :  { %922 = vst.msk [vmem:[#allocation6] sm:$0x3] %vm921_vm4, %v919_v19 }
 0xe06   :  { %v1301_v14 = vpop.permute.xlu1 %1300 }
 0xe0a   :  { %v1492_v28 = vpop.permute.xlu1 %1491 }
 0xe0e   :  { %v1872_v33 = vpop.permute.xlu1 %1871 }
 0xe1b   :  { %v1106_v20 = vpop.xlane.xlu0 %1105 }
 0xe1c   :  { %v1107_v34 = vadd.f32 %v4199_v61, %v1106_v20 }
 0xe1e   :  { %1109 = vrot.lane.b32.xlu0 %v1107_v34, %s3557_s11 }
 0xe22   :  { %1682 = vrot.lane.b32.xlu0 %v4414_v24, %s3558_s1 }
 0xe26   :  { %2060 = vrot.lane.b32.xlu0 %v4304_v15, %s3559_s12  ;;  %v2250_v15 = vpop.permute.xlu1 %2249 }
 0xe2a   :  { %2438 = vrot.lane.b32.xlu0 %v2436_v1, %s3560_s13 }
 0xe90   :  { %v1110_v29 = vpop.permute.xlu0 %1109 }
 0xe91   :  { %1113 = vst.msk [vmem:[#allocation6] sm:$0x3] %vm1112_vm5, %v1110_v29 }
 0xe92   :  { %1304 = vst.msk [vmem:[#allocation6] sm:$0x3] %vm1303_vm6, %v1301_v14 }
 0xe93   :  { %1495 = vst.msk [vmem:[#allocation6] sm:$0x3] %vm1494_vm7, %v1492_v28 }
 0xe94   :  { %v1683_v37 = vpop.permute.xlu0 %1682 }
 0xe95   :  { %1686 = vst.msk [vmem:[#allocation6] sm:$0x3] %vm1685_vm8, %v1683_v37 }
 0xe96   :  { %1875 = vst.msk [vmem:[#allocation6] sm:$0x3] %vm1874_vm9, %v1872_v33 }
 0xe98   :  { %v2061_v61 = vpop.permute.xlu0 %2060 }
 0xe99   :  { %2064 = vst.msk [vmem:[#allocation6] sm:$0x3] %vm2063_vm10, %v2061_v61 }
 0xe9a   :  { %2253 = vst.msk [vmem:[#allocation6] sm:$0x3] %vm2252_vm11, %v2250_v15 }
 0xe9c   :  { %v2439_v41 = vpop.permute.xlu0 %2438 }
 0xe9d   :  { %2442 = vst.msk [vmem:[#allocation6] sm:$0x3] %vm2441_vm12, %v2439_v41 }
 0xe9e   :  { %3523 = shalt.err (!%p3520_p12)
}
 0xe9f   :  { %s3524_s2 = scalar_lea.hbm %s4387_s6, 32 }
 0xea0   :  { %p3525_p13 = scmp.ne.s32.totalorder %s4387_s6, %s3524_s2  ;;  %p3528_p0 = scmp.lt.u32.totalorder %s3524_s2, %s4387_s6 }
 0xea2   :  { %p3530_p1 = pnand %p3528_p0, %p3525_p13 }
 0xea4   :  { %3533 = shalt.err (!%p3530_p1)
}
 0xea5   :  { %2452 = dma.vmem_to_hbm [thread:$0]  %s2450_s15, 32, %s4387_s6, [#allocation5]  }
 0xea6   :  { %3536 = dma.done.wait [#allocation5], 32  }
 0xea7   :  { %3537 = vsyncadd [#allocation5], 4294967264 }
 0xea8   :  { %2456 = vsyncpa [#allocation4], 1 }
 0xea9   :  { %2457 = vsyncpa [#allocation5], 1 }

</bundles_post_ra>
